<compile_context>
chip_gen: v7x
topology: tpu7x:2x2x1
jax: 0.10.0
libtpu: 0.0.40
codegen_flags: <defaults>
</compile_context>

<pallas_src>
import jax
import jax.numpy as jnp
from jax.experimental import pallas as pl
from jax.experimental.pallas import tpu as pltpu  # noqa: F401  (imported per convention)

# ----------------------- model hyperparameters (small) -----------------------
VOCAB = 20
EMB_DIM = 16
HIDDEN = 32          # 4*H = 128 -> one lane tile per direction
NUM_LAYERS = 2
BATCH = 2
BATCH_PAD = 8        # pad batch rows to a full sublane tile
SEQ = 8


# --------------------------- fused Pallas kernel ------------------------------
def _lstm_step(gates, c):
    """One LSTM cell update. gates: (BP, 4H), columns ordered [i, f, o | g]."""
    H = HIDDEN
    sg = jax.nn.sigmoid(gates[:, 0:3 * H])      # i, f, o in a single EUP push
    g = jnp.tanh(gates[:, 3 * H:4 * H])
    i, f, o = sg[:, 0:H], sg[:, H:2 * H], sg[:, 2 * H:3 * H]
    c_new = f * c + i * g
    h_new = o * jnp.tanh(c_new)
    return h_new, c_new


def _bilstm_unrolled(gx, whh_f, whh_b, collect_seq):
    """Bidirectional LSTM layer, statically unrolled over time.

    gx    : (T*BP, 8H) hoisted input projection + bias; lanes [0:4H] fwd, [4H:8H] bwd.
            Row t*BP + b is the projection of the input at time t, batch row b.
    whh_f : (H, 4H) fwd recurrent weights (gate cols [i,f,o,g]); whh_b likewise for bwd.
    Returns (fwd hidden @ time T-1, bwd hidden @ time T-1, outs_f, outs_b) where
    outs_f[t]/outs_b[t] are (BP, H) per-time hidden states (only if collect_seq).
    """
    T, BP, H = SEQ, BATCH_PAD, HIDDEN
    G = 4 * H
    hf = jnp.zeros((BP, H), jnp.float32)
    cf = jnp.zeros((BP, H), jnp.float32)
    hb = jnp.zeros((BP, H), jnp.float32)
    cb = jnp.zeros((BP, H), jnp.float32)
    outs_f = [None] * T
    outs_b = [None] * T
    bwd_last = None

    for s in range(T):                          # static unroll (T is tiny)
        tf, tb = s, T - 1 - s                   # fwd consumes time s, bwd time T-1-s
        # Whole-sublane-tile row views (BP = 8) and lane-tile-aligned column halves.
        gf = gx[tf * BP:(tf + 1) * BP, 0:G] + jnp.dot(
            hf, whh_f, preferred_element_type=jnp.float32)
        gb = gx[tb * BP:(tb + 1) * BP, G:2 * G] + jnp.dot(
            hb, whh_b, preferred_element_type=jnp.float32)
        hf, cf = _lstm_step(gf, cf)
        hb, cb = _lstm_step(gb, cb)
        if collect_seq:
            outs_f[tf] = hf
            outs_b[tb] = hb
        if s == 0:
            bwd_last = hb                       # bwd hidden at time T-1 (its first step)

    return hf, bwd_last, outs_f, outs_b


def lstm_net_kernel(ids_ref, table0_ref, b0_ref, whh0f_ref, whh0b_ref,
                    wih1f_ref, wih1b_ref, b1_ref, whh1f_ref, whh1b_ref,
                    clsw_ref, clsb_ref, o_ref):
    T, BP, H, V = SEQ, BATCH_PAD, HIDDEN, VOCAB

    # Embedding lookup folded into layer-0's input projection:
    # onehot @ (embedding @ W_ih0) + b0  -- exact row selection, single MXU pass.
    iota = jax.lax.broadcasted_iota(jnp.int32, (T * BP, V), 1)
    onehot = (iota == ids_ref[...]).astype(jnp.float32)                    # (T*BP, V)
    gx0 = jnp.dot(onehot, table0_ref[...],
                  preferred_element_type=jnp.float32) + b0_ref[...]        # (T*BP, 8H)

    # Layer 0: need the full output sequence -> kept in registers (no VMEM scratch).
    _, _, outs_f, outs_b = _bilstm_unrolled(gx0, whh0f_ref[...], whh0b_ref[...], True)

    # Layer-1 hoisted input projection, split by which feature half it consumes
    # (avoids any fwd|bwd lane concat): gx1 = x1_fwd @ W_f + x1_bwd @ W_b + b1.
    x1f = jnp.concatenate(outs_f, axis=0)                                   # (T*BP, H)
    x1b = jnp.concatenate(outs_b, axis=0)                                   # (T*BP, H)
    gx1 = (jnp.dot(x1f, wih1f_ref[...], preferred_element_type=jnp.float32)
           + jnp.dot(x1b, wih1b_ref[...], preferred_element_type=jnp.float32)
           + b1_ref[...])                                                   # (T*BP, 8H)

    # Layer 1: only the time T-1 features feed the classifier.
    fwd_last, bwd_last, _, _ = _bilstm_unrolled(gx1, whh1f_ref[...], whh1b_ref[...], False)

    # Dropout (eval mode) is identity. Classifier Linear(2H->1)+Sigmoid as VPU reduce.
    logits = (jnp.sum(fwd_last * clsw_ref[:, 0:H], axis=-1, keepdims=True)
              + jnp.sum(bwd_last * clsw_ref[:, H:2 * H], axis=-1, keepdims=True)
              + clsb_ref[...])                                              # (BP, 1)
    o_ref[...] = jax.nn.sigmoid(logits)


# ----------------------------- wrapper -----------------------------------------
def _full_spec(shape):
    return pl.BlockSpec(shape, lambda: (0,) * len(shape))


def lstm_net_forward(token_ids, packed):
    """Fused Pallas forward. token_ids: (B, T) int32 -> (B, 1) float32."""
    T, B, BP, H, V = SEQ, BATCH, BATCH_PAD, HIDDEN, VOCAB

    # Time-major, batch rows padded to 8 sublanes: row t*BP + b holds token_ids[b, t].
    ids_tb = jnp.transpose(token_ids).astype(jnp.int32)                      # (T, B)
    ids_pad = jnp.zeros((T, BP), jnp.int32).at[:, :B].set(ids_tb)            # pad = token 0
    ids2d = ids_pad.reshape(T * BP, 1)

    out_padded = pl.pallas_call(
        lstm_net_kernel,
        out_shape=jax.ShapeDtypeStruct((BP, 1), jnp.float32),
        in_specs=[
            _full_spec((T * BP, 1)),        # token ids (time-major, batch-padded)
            _full_spec((V, 8 * H)),         # table0 = embedding @ W_ih0  [fwd|bwd]
            _full_spec((1, 8 * H)),         # layer 0 bias                [fwd|bwd]
            _full_spec((H, 4 * H)),         # layer 0 W_hh fwd
            _full_spec((H, 4 * H)),         # layer 0 W_hh bwd
            _full_spec((H, 8 * H)),         # layer 1 W_ih rows for fwd features
            _full_spec((H, 8 * H)),         # layer 1 W_ih rows for bwd features
            _full_spec((1, 8 * H)),         # layer 1 bias                [fwd|bwd]
            _full_spec((H, 4 * H)),         # layer 1 W_hh fwd
            _full_spec((H, 4 * H)),         # layer 1 W_hh bwd
            _full_spec((1, 2 * H)),         # classifier weight (row vector)
            _full_spec((1, 1)),             # classifier bias
        ],
        out_specs=_full_spec((BP, 1)),
    )(ids2d, packed["table0"], packed["b0"], packed["whh0_f"], packed["whh0_b"],
      packed["wih1_from_f"], packed["wih1_from_b"], packed["b1"],
      packed["whh1_f"], packed["whh1_b"], packed["cls_w"], packed["cls_b"])

    return out_padded[:B]


def _reorder_gate_cols(w):
    """Reorder the trailing 4H gate columns from [i, f, g, o] to [i, f, o, g]."""
    H = HIDDEN
    return jnp.concatenate([w[..., 0:2 * H], w[..., 3 * H:4 * H], w[..., 2 * H:3 * H]],
                           axis=-1)


def pack_params(params):
    """One-time offline weight prep (gate reorder, fwd|bwd packing, embedding fold)."""
    H = HIDDEN
    emb = params["embedding"]

    # Layer 0: fold the embedding table into the input projection (exact: one-hot rows).
    wih0 = jnp.concatenate([_reorder_gate_cols(params["w_ih_l0_fwd"]),
                            _reorder_gate_cols(params["w_ih_l0_bwd"])], axis=1)  # (E, 8H)
    packed = {
        "table0": emb @ wih0,                                                    # (V, 8H)
        "b0": jnp.concatenate([_reorder_gate_cols(params["b_l0_fwd"]),
                               _reorder_gate_cols(params["b_l0_bwd"])], axis=1),
        "whh0_f": _reorder_gate_cols(params["w_hh_l0_fwd"]),
        "whh0_b": _reorder_gate_cols(params["w_hh_l0_bwd"]),
    }

    # Layer 1: split W_ih rows by which half of the layer-0 features they consume.
    wih1 = jnp.concatenate([_reorder_gate_cols(params["w_ih_l1_fwd"]),
                            _reorder_gate_cols(params["w_ih_l1_bwd"])], axis=1)  # (2H, 8H)
    packed["wih1_from_f"] = wih1[0:H]
    packed["wih1_from_b"] = wih1[H:2 * H]
    packed["b1"] = jnp.concatenate([_reorder_gate_cols(params["b_l1_fwd"]),
                                    _reorder_gate_cols(params["b_l1_bwd"])], axis=1)
    packed["whh1_f"] = _reorder_gate_cols(params["w_hh_l1_fwd"])
    packed["whh1_b"] = _reorder_gate_cols(params["w_hh_l1_bwd"])

    packed["cls_w"] = params["cls_w"].reshape(1, 2 * H)
    packed["cls_b"] = params["cls_b"]
    return packed


# ------------------------- pure-JAX reference ----------------------------------
def _lstm_cell_ref(x, h, c, w_ih, w_hh, b):
    gates = x @ w_ih + h @ w_hh + b
    i, f, g, o = jnp.split(gates, 4, axis=-1)
    i, f, o = jax.nn.sigmoid(i), jax.nn.sigmoid(f), jax.nn.sigmoid(o)
    g = jnp.tanh(g)
    c = f * c + i * g
    h = o * jnp.tanh(c)
    return h, c


def _lstm_dir_ref(x_tbd, w_ih, w_hh, b):
    T, B, _ = x_tbd.shape
    H = w_hh.shape[0]
    h = jnp.zeros((B, H), jnp.float32)
    c = jnp.zeros((B, H), jnp.float32)
    outs = []
    for t in range(T):
        h, c = _lstm_cell_ref(x_tbd[t], h, c, w_ih, w_hh, b)
        outs.append(h)
    return jnp.stack(outs, axis=0)


def lstm_net_reference(token_ids, params):
    emb = params["embedding"][token_ids]
    x = jnp.transpose(emb, (1, 0, 2))
    for l in range(NUM_LAYERS):
        fwd = _lstm_dir_ref(x, params[f"w_ih_l{l}_fwd"], params[f"w_hh_l{l}_fwd"],
                            params[f"b_l{l}_fwd"])
        bwd = _lstm_dir_ref(x[::-1], params[f"w_ih_l{l}_bwd"], params[f"w_hh_l{l}_bwd"],
                            params[f"b_l{l}_bwd"])[::-1]
        x = jnp.concatenate([fwd, bwd], axis=-1)
    last = x[-1]
    return jax.nn.sigmoid(last @ params["cls_w"] + params["cls_b"])


# ----------------------------- params init ------------------------------------
def init_params(key):
    params = {}
    k_emb, k_rest = jax.random.split(key)
    params["embedding"] = jax.random.normal(k_emb, (VOCAB, EMB_DIM), jnp.float32)

    keys = jax.random.split(k_rest, NUM_LAYERS * 2 * 3 + 2)
    ki = 0
    for l in range(NUM_LAYERS):
        d_in = EMB_DIM if l == 0 else 2 * HIDDEN
        for d in ("fwd", "bwd"):
            params[f"w_ih_l{l}_{d}"] = 0.1 * jax.random.normal(
                keys[ki], (d_in, 4 * HIDDEN), jnp.float32); ki += 1
            params[f"w_hh_l{l}_{d}"] = 0.1 * jax.random.normal(
                keys[ki], (HIDDEN, 4 * HIDDEN), jnp.float32); ki += 1
            # b_ih + b_hh combined into one (1, 4H) bias
            params[f"b_l{l}_{d}"] = 0.1 * jax.random.normal(
                keys[ki], (1, 4 * HIDDEN), jnp.float32); ki += 1
    params["cls_w"] = 0.1 * jax.random.normal(keys[ki], (2 * HIDDEN, 1), jnp.float32); ki += 1
    params["cls_b"] = 0.1 * jax.random.normal(keys[ki], (1, 1), jnp.float32); ki += 1
    return params


# ----------------------------------- main ---------------------------------------
if __name__ == "__main__":
    key = jax.random.PRNGKey(0)
    k_params, k_tokens = jax.random.split(key)
    params = init_params(k_params)
    packed = pack_params(params)      # one-time offline weight packing
    token_ids = jax.random.randint(k_tokens, (BATCH, SEQ), 0, VOCAB, dtype=jnp.int32)

    out = jax.block_until_ready(lstm_net_forward(token_ids, packed))
    ref = jax.block_until_ready(lstm_net_reference(token_ids, params))

    assert out.shape == (BATCH, 1), out.shape
    assert jnp.allclose(out, ref, atol=1e-4, rtol=1e-4), (out, ref)
    print("KERNEL_OK")
</pallas_src>

<mosaic_0001>
module attributes {stable_mosaic.version = 11 : i64} {
  func.func @lstm_net_kernel(%arg0: memref<64x1xi32, #tpu.memory_space<vmem>>, %arg1: memref<20x256xf32, #tpu.memory_space<vmem>>, %arg2: memref<1x256xf32, #tpu.memory_space<vmem>>, %arg3: memref<32x128xf32, #tpu.memory_space<vmem>>, %arg4: memref<32x128xf32, #tpu.memory_space<vmem>>, %arg5: memref<32x256xf32, #tpu.memory_space<vmem>>, %arg6: memref<32x256xf32, #tpu.memory_space<vmem>>, %arg7: memref<1x256xf32, #tpu.memory_space<vmem>>, %arg8: memref<32x128xf32, #tpu.memory_space<vmem>>, %arg9: memref<32x128xf32, #tpu.memory_space<vmem>>, %arg10: memref<1x64xf32, #tpu.memory_space<vmem>>, %arg11: memref<1x1xf32, #tpu.memory_space<vmem>>, %arg12: memref<8x1xf32, #tpu.memory_space<vmem>>) attributes {dimension_semantics = [], scalar_prefetch = 0 : i64, scratch_operands = 0 : i64, tpu.core_type = #tpu.core_type<tc>} {
    %0 = tpu.iota {dimensions = array<i32: 1>} : vector<64x20xi32>
    %c0 = arith.constant 0 : index
    %c0_0 = arith.constant 0 : index
    %1 = vector.load %arg0[%c0, %c0_0] : memref<64x1xi32, #tpu.memory_space<vmem>>, vector<64x1xi32>
    %2 = vector.broadcast %1 : vector<64x1xi32> to vector<64x20xi32>
    %3 = arith.cmpi eq, %0, %2 : vector<64x20xi32>
    %4 = arith.extui %3 : vector<64x20xi1> to vector<64x20xi32>
    %5 = arith.sitofp %4 : vector<64x20xi32> to vector<64x20xf32>
    %c0_1 = arith.constant 0 : index
    %c0_2 = arith.constant 0 : index
    %6 = vector.load %arg1[%c0_1, %c0_2] : memref<20x256xf32, #tpu.memory_space<vmem>>, vector<20x256xf32>
    %cst = arith.constant dense<0.000000e+00> : vector<64x256xf32>
    %7 = tpu.matmul %5, %6, %cst {dimension_numbers = #tpu.dot_dimension_numbers<[1], [0], [0], [1], [0, 0, 1, 1], [], []>} : vector<64x20xf32>, vector<20x256xf32>, vector<64x256xf32> -> vector<64x256xf32>
    %c0_3 = arith.constant 0 : index
    %c0_4 = arith.constant 0 : index
    %8 = vector.load %arg2[%c0_3, %c0_4] : memref<1x256xf32, #tpu.memory_space<vmem>>, vector<1x256xf32>
    %9 = vector.broadcast %8 : vector<1x256xf32> to vector<64x256xf32>
    %10 = arith.addf %7, %9 : vector<64x256xf32>
    %c0_5 = arith.constant 0 : index
    %c0_6 = arith.constant 0 : index
    %11 = vector.load %arg3[%c0_5, %c0_6] : memref<32x128xf32, #tpu.memory_space<vmem>>, vector<32x128xf32>
    %c0_7 = arith.constant 0 : index
    %c0_8 = arith.constant 0 : index
    %12 = vector.load %arg4[%c0_7, %c0_8] : memref<32x128xf32, #tpu.memory_space<vmem>>, vector<32x128xf32>
    %cst_9 = arith.constant 0.000000e+00 : f32
    %13 = vector.broadcast %cst_9 : f32 to vector<8x32xf32>
    %cst_10 = arith.constant 0.000000e+00 : f32
    %14 = vector.broadcast %cst_10 : f32 to vector<8x32xf32>
    %cst_11 = arith.constant 0.000000e+00 : f32
    %15 = vector.broadcast %cst_11 : f32 to vector<8x32xf32>
    %cst_12 = arith.constant 0.000000e+00 : f32
    %16 = vector.broadcast %cst_12 : f32 to vector<8x32xf32>
    %17 = vector.extract_strided_slice %10 {offsets = [0, 0], sizes = [8, 128], strides = [1, 1]} : vector<64x256xf32> to vector<8x128xf32>
    %cst_13 = arith.constant dense<0.000000e+00> : vector<8x128xf32>
    %18 = tpu.matmul %13, %11, %cst_13 {dimension_numbers = #tpu.dot_dimension_numbers<[1], [0], [0], [1], [0, 0, 1, 1], [], []>} : vector<8x32xf32>, vector<32x128xf32>, vector<8x128xf32> -> vector<8x128xf32>
    %19 = arith.addf %17, %18 : vector<8x128xf32>
    %20 = vector.extract_strided_slice %10 {offsets = [56, 128], sizes = [8, 128], strides = [1, 1]} : vector<64x256xf32> to vector<8x128xf32>
    %cst_14 = arith.constant dense<0.000000e+00> : vector<8x128xf32>
    %21 = tpu.matmul %15, %12, %cst_14 {dimension_numbers = #tpu.dot_dimension_numbers<[1], [0], [0], [1], [0, 0, 1, 1], [], []>} : vector<8x32xf32>, vector<32x128xf32>, vector<8x128xf32> -> vector<8x128xf32>
    %22 = arith.addf %20, %21 : vector<8x128xf32>
    %23 = vector.extract_strided_slice %19 {offsets = [0, 0], sizes = [8, 96], strides = [1, 1]} : vector<8x128xf32> to vector<8x96xf32>
    %24 = arith.negf %23 : vector<8x96xf32>
    %25 = math.exp %24 : vector<8x96xf32>
    %cst_15 = arith.constant 1.000000e+00 : f32
    %26 = vector.broadcast %cst_15 : f32 to vector<8x96xf32>
    %27 = arith.addf %26, %25 : vector<8x96xf32>
    %28 = arith.divf %26, %27 : vector<8x96xf32>
    %29 = vector.extract_strided_slice %19 {offsets = [0, 96], sizes = [8, 32], strides = [1, 1]} : vector<8x128xf32> to vector<8x32xf32>
    %30 = math.tanh %29 : vector<8x32xf32>
    %31 = vector.extract_strided_slice %28 {offsets = [0, 0], sizes = [8, 32], strides = [1, 1]} : vector<8x96xf32> to vector<8x32xf32>
    %32 = vector.extract_strided_slice %28 {offsets = [0, 32], sizes = [8, 32], strides = [1, 1]} : vector<8x96xf32> to vector<8x32xf32>
    %33 = vector.extract_strided_slice %28 {offsets = [0, 64], sizes = [8, 32], strides = [1, 1]} : vector<8x96xf32> to vector<8x32xf32>
    %34 = arith.mulf %32, %14 : vector<8x32xf32>
    %35 = arith.mulf %31, %30 : vector<8x32xf32>
    %36 = arith.addf %34, %35 : vector<8x32xf32>
    %37 = math.tanh %36 : vector<8x32xf32>
    %38 = arith.mulf %33, %37 : vector<8x32xf32>
    %39 = vector.extract_strided_slice %22 {offsets = [0, 0], sizes = [8, 96], strides = [1, 1]} : vector<8x128xf32> to vector<8x96xf32>
    %40 = arith.negf %39 : vector<8x96xf32>
    %41 = math.exp %40 : vector<8x96xf32>
    %cst_16 = arith.constant 1.000000e+00 : f32
    %42 = vector.broadcast %cst_16 : f32 to vector<8x96xf32>
    %43 = arith.addf %42, %41 : vector<8x96xf32>
    %44 = arith.divf %42, %43 : vector<8x96xf32>
    %45 = vector.extract_strided_slice %22 {offsets = [0, 96], sizes = [8, 32], strides = [1, 1]} : vector<8x128xf32> to vector<8x32xf32>
    %46 = math.tanh %45 : vector<8x32xf32>
    %47 = vector.extract_strided_slice %44 {offsets = [0, 0], sizes = [8, 32], strides = [1, 1]} : vector<8x96xf32> to vector<8x32xf32>
    %48 = vector.extract_strided_slice %44 {offsets = [0, 32], sizes = [8, 32], strides = [1, 1]} : vector<8x96xf32> to vector<8x32xf32>
    %49 = vector.extract_strided_slice %44 {offsets = [0, 64], sizes = [8, 32], strides = [1, 1]} : vector<8x96xf32> to vector<8x32xf32>
    %50 = arith.mulf %48, %16 : vector<8x32xf32>
    %51 = arith.mulf %47, %46 : vector<8x32xf32>
    %52 = arith.addf %50, %51 : vector<8x32xf32>
    %53 = math.tanh %52 : vector<8x32xf32>
    %54 = arith.mulf %49, %53 : vector<8x32xf32>
    %55 = vector.extract_strided_slice %10 {offsets = [8, 0], sizes = [8, 128], strides = [1, 1]} : vector<64x256xf32> to vector<8x128xf32>
    %cst_17 = arith.constant dense<0.000000e+00> : vector<8x128xf32>
    %56 = tpu.matmul %38, %11, %cst_17 {dimension_numbers = #tpu.dot_dimension_numbers<[1], [0], [0], [1], [0, 0, 1, 1], [], []>} : vector<8x32xf32>, vector<32x128xf32>, vector<8x128xf32> -> vector<8x128xf32>
    %57 = arith.addf %55, %56 : vector<8x128xf32>
    %58 = vector.extract_strided_slice %10 {offsets = [48, 128], sizes = [8, 128], strides = [1, 1]} : vector<64x256xf32> to vector<8x128xf32>
    %cst_18 = arith.constant dense<0.000000e+00> : vector<8x128xf32>
    %59 = tpu.matmul %54, %12, %cst_18 {dimension_numbers = #tpu.dot_dimension_numbers<[1], [0], [0], [1], [0, 0, 1, 1], [], []>} : vector<8x32xf32>, vector<32x128xf32>, vector<8x128xf32> -> vector<8x128xf32>
    %60 = arith.addf %58, %59 : vector<8x128xf32>
    %61 = vector.extract_strided_slice %57 {offsets = [0, 0], sizes = [8, 96], strides = [1, 1]} : vector<8x128xf32> to vector<8x96xf32>
    %62 = arith.negf %61 : vector<8x96xf32>
    %63 = math.exp %62 : vector<8x96xf32>
    %cst_19 = arith.constant 1.000000e+00 : f32
    %64 = vector.broadcast %cst_19 : f32 to vector<8x96xf32>
    %65 = arith.addf %64, %63 : vector<8x96xf32>
    %66 = arith.divf %64, %65 : vector<8x96xf32>
    %67 = vector.extract_strided_slice %57 {offsets = [0, 96], sizes = [8, 32], strides = [1, 1]} : vector<8x128xf32> to vector<8x32xf32>
    %68 = math.tanh %67 : vector<8x32xf32>
    %69 = vector.extract_strided_slice %66 {offsets = [0, 0], sizes = [8, 32], strides = [1, 1]} : vector<8x96xf32> to vector<8x32xf32>
    %70 = vector.extract_strided_slice %66 {offsets = [0, 32], sizes = [8, 32], strides = [1, 1]} : vector<8x96xf32> to vector<8x32xf32>
    %71 = vector.extract_strided_slice %66 {offsets = [0, 64], sizes = [8, 32], strides = [1, 1]} : vector<8x96xf32> to vector<8x32xf32>
    %72 = arith.mulf %70, %36 : vector<8x32xf32>
    %73 = arith.mulf %69, %68 : vector<8x32xf32>
    %74 = arith.addf %72, %73 : vector<8x32xf32>
    %75 = math.tanh %74 : vector<8x32xf32>
    %76 = arith.mulf %71, %75 : vector<8x32xf32>
    %77 = vector.extract_strided_slice %60 {offsets = [0, 0], sizes = [8, 96], strides = [1, 1]} : vector<8x128xf32> to vector<8x96xf32>
    %78 = arith.negf %77 : vector<8x96xf32>
    %79 = math.exp %78 : vector<8x96xf32>
    %cst_20 = arith.constant 1.000000e+00 : f32
    %80 = vector.broadcast %cst_20 : f32 to vector<8x96xf32>
    %81 = arith.addf %80, %79 : vector<8x96xf32>
    %82 = arith.divf %80, %81 : vector<8x96xf32>
    %83 = vector.extract_strided_slice %60 {offsets = [0, 96], sizes = [8, 32], strides = [1, 1]} : vector<8x128xf32> to vector<8x32xf32>
    %84 = math.tanh %83 : vector<8x32xf32>
    %85 = vector.extract_strided_slice %82 {offsets = [0, 0], sizes = [8, 32], strides = [1, 1]} : vector<8x96xf32> to vector<8x32xf32>
    %86 = vector.extract_strided_slice %82 {offsets = [0, 32], sizes = [8, 32], strides = [1, 1]} : vector<8x96xf32> to vector<8x32xf32>
    %87 = vector.extract_strided_slice %82 {offsets = [0, 64], sizes = [8, 32], strides = [1, 1]} : vector<8x96xf32> to vector<8x32xf32>
    %88 = arith.mulf %86, %52 : vector<8x32xf32>
    %89 = arith.mulf %85, %84 : vector<8x32xf32>
    %90 = arith.addf %88, %89 : vector<8x32xf32>
    %91 = math.tanh %90 : vector<8x32xf32>
    %92 = arith.mulf %87, %91 : vector<8x32xf32>
    %93 = vector.extract_strided_slice %10 {offsets = [16, 0], sizes = [8, 128], strides = [1, 1]} : vector<64x256xf32> to vector<8x128xf32>
    %cst_21 = arith.constant dense<0.000000e+00> : vector<8x128xf32>
    %94 = tpu.matmul %76, %11, %cst_21 {dimension_numbers = #tpu.dot_dimension_numbers<[1], [0], [0], [1], [0, 0, 1, 1], [], []>} : vector<8x32xf32>, vector<32x128xf32>, vector<8x128xf32> -> vector<8x128xf32>
    %95 = arith.addf %93, %94 : vector<8x128xf32>
    %96 = vector.extract_strided_slice %10 {offsets = [40, 128], sizes = [8, 128], strides = [1, 1]} : vector<64x256xf32> to vector<8x128xf32>
    %cst_22 = arith.constant dense<0.000000e+00> : vector<8x128xf32>
    %97 = tpu.matmul %92, %12, %cst_22 {dimension_numbers = #tpu.dot_dimension_numbers<[1], [0], [0], [1], [0, 0, 1, 1], [], []>} : vector<8x32xf32>, vector<32x128xf32>, vector<8x128xf32> -> vector<8x128xf32>
    %98 = arith.addf %96, %97 : vector<8x128xf32>
    %99 = vector.extract_strided_slice %95 {offsets = [0, 0], sizes = [8, 96], strides = [1, 1]} : vector<8x128xf32> to vector<8x96xf32>
    %100 = arith.negf %99 : vector<8x96xf32>
    %101 = math.exp %100 : vector<8x96xf32>
    %cst_23 = arith.constant 1.000000e+00 : f32
    %102 = vector.broadcast %cst_23 : f32 to vector<8x96xf32>
    %103 = arith.addf %102, %101 : vector<8x96xf32>
    %104 = arith.divf %102, %103 : vector<8x96xf32>
    %105 = vector.extract_strided_slice %95 {offsets = [0, 96], sizes = [8, 32], strides = [1, 1]} : vector<8x128xf32> to vector<8x32xf32>
    %106 = math.tanh %105 : vector<8x32xf32>
    %107 = vector.extract_strided_slice %104 {offsets = [0, 0], sizes = [8, 32], strides = [1, 1]} : vector<8x96xf32> to vector<8x32xf32>
    %108 = vector.extract_strided_slice %104 {offsets = [0, 32], sizes = [8, 32], strides = [1, 1]} : vector<8x96xf32> to vector<8x32xf32>
    %109 = vector.extract_strided_slice %104 {offsets = [0, 64], sizes = [8, 32], strides = [1, 1]} : vector<8x96xf32> to vector<8x32xf32>
    %110 = arith.mulf %108, %74 : vector<8x32xf32>
    %111 = arith.mulf %107, %106 : vector<8x32xf32>
    %112 = arith.addf %110, %111 : vector<8x32xf32>
    %113 = math.tanh %112 : vector<8x32xf32>
    %114 = arith.mulf %109, %113 : vector<8x32xf32>
    %115 = vector.extract_strided_slice %98 {offsets = [0, 0], sizes = [8, 96], strides = [1, 1]} : vector<8x128xf32> to vector<8x96xf32>
    %116 = arith.negf %115 : vector<8x96xf32>
    %117 = math.exp %116 : vector<8x96xf32>
    %cst_24 = arith.constant 1.000000e+00 : f32
    %118 = vector.broadcast %cst_24 : f32 to vector<8x96xf32>
    %119 = arith.addf %118, %117 : vector<8x96xf32>
    %120 = arith.divf %118, %119 : vector<8x96xf32>
    %121 = vector.extract_strided_slice %98 {offsets = [0, 96], sizes = [8, 32], strides = [1, 1]} : vector<8x128xf32> to vector<8x32xf32>
    %122 = math.tanh %121 : vector<8x32xf32>
    %123 = vector.extract_strided_slice %120 {offsets = [0, 0], sizes = [8, 32], strides = [1, 1]} : vector<8x96xf32> to vector<8x32xf32>
    %124 = vector.extract_strided_slice %120 {offsets = [0, 32], sizes = [8, 32], strides = [1, 1]} : vector<8x96xf32> to vector<8x32xf32>
    %125 = vector.extract_strided_slice %120 {offsets = [0, 64], sizes = [8, 32], strides = [1, 1]} : vector<8x96xf32> to vector<8x32xf32>
    %126 = arith.mulf %124, %90 : vector<8x32xf32>
    %127 = arith.mulf %123, %122 : vector<8x32xf32>
    %128 = arith.addf %126, %127 : vector<8x32xf32>
    %129 = math.tanh %128 : vector<8x32xf32>
    %130 = arith.mulf %125, %129 : vector<8x32xf32>
    %131 = vector.extract_strided_slice %10 {offsets = [24, 0], sizes = [8, 128], strides = [1, 1]} : vector<64x256xf32> to vector<8x128xf32>
    %cst_25 = arith.constant dense<0.000000e+00> : vector<8x128xf32>
    %132 = tpu.matmul %114, %11, %cst_25 {dimension_numbers = #tpu.dot_dimension_numbers<[1], [0], [0], [1], [0, 0, 1, 1], [], []>} : vector<8x32xf32>, vector<32x128xf32>, vector<8x128xf32> -> vector<8x128xf32>
    %133 = arith.addf %131, %132 : vector<8x128xf32>
    %134 = vector.extract_strided_slice %10 {offsets = [32, 128], sizes = [8, 128], strides = [1, 1]} : vector<64x256xf32> to vector<8x128xf32>
    %cst_26 = arith.constant dense<0.000000e+00> : vector<8x128xf32>
    %135 = tpu.matmul %130, %12, %cst_26 {dimension_numbers = #tpu.dot_dimension_numbers<[1], [0], [0], [1], [0, 0, 1, 1], [], []>} : vector<8x32xf32>, vector<32x128xf32>, vector<8x128xf32> -> vector<8x128xf32>
    %136 = arith.addf %134, %135 : vector<8x128xf32>
    %137 = vector.extract_strided_slice %133 {offsets = [0, 0], sizes = [8, 96], strides = [1, 1]} : vector<8x128xf32> to vector<8x96xf32>
    %138 = arith.negf %137 : vector<8x96xf32>
    %139 = math.exp %138 : vector<8x96xf32>
    %cst_27 = arith.constant 1.000000e+00 : f32
    %140 = vector.broadcast %cst_27 : f32 to vector<8x96xf32>
    %141 = arith.addf %140, %139 : vector<8x96xf32>
    %142 = arith.divf %140, %141 : vector<8x96xf32>
    %143 = vector.extract_strided_slice %133 {offsets = [0, 96], sizes = [8, 32], strides = [1, 1]} : vector<8x128xf32> to vector<8x32xf32>
    %144 = math.tanh %143 : vector<8x32xf32>
    %145 = vector.extract_strided_slice %142 {offsets = [0, 0], sizes = [8, 32], strides = [1, 1]} : vector<8x96xf32> to vector<8x32xf32>
    %146 = vector.extract_strided_slice %142 {offsets = [0, 32], sizes = [8, 32], strides = [1, 1]} : vector<8x96xf32> to vector<8x32xf32>
    %147 = vector.extract_strided_slice %142 {offsets = [0, 64], sizes = [8, 32], strides = [1, 1]} : vector<8x96xf32> to vector<8x32xf32>
    %148 = arith.mulf %146, %112 : vector<8x32xf32>
    %149 = arith.mulf %145, %144 : vector<8x32xf32>
    %150 = arith.addf %148, %149 : vector<8x32xf32>
    %151 = math.tanh %150 : vector<8x32xf32>
    %152 = arith.mulf %147, %151 : vector<8x32xf32>
    %153 = vector.extract_strided_slice %136 {offsets = [0, 0], sizes = [8, 96], strides = [1, 1]} : vector<8x128xf32> to vector<8x96xf32>
    %154 = arith.negf %153 : vector<8x96xf32>
    %155 = math.exp %154 : vector<8x96xf32>
    %cst_28 = arith.constant 1.000000e+00 : f32
    %156 = vector.broadcast %cst_28 : f32 to vector<8x96xf32>
    %157 = arith.addf %156, %155 : vector<8x96xf32>
    %158 = arith.divf %156, %157 : vector<8x96xf32>
    %159 = vector.extract_strided_slice %136 {offsets = [0, 96], sizes = [8, 32], strides = [1, 1]} : vector<8x128xf32> to vector<8x32xf32>
    %160 = math.tanh %159 : vector<8x32xf32>
    %161 = vector.extract_strided_slice %158 {offsets = [0, 0], sizes = [8, 32], strides = [1, 1]} : vector<8x96xf32> to vector<8x32xf32>
    %162 = vector.extract_strided_slice %158 {offsets = [0, 32], sizes = [8, 32], strides = [1, 1]} : vector<8x96xf32> to vector<8x32xf32>
    %163 = vector.extract_strided_slice %158 {offsets = [0, 64], sizes = [8, 32], strides = [1, 1]} : vector<8x96xf32> to vector<8x32xf32>
    %164 = arith.mulf %162, %128 : vector<8x32xf32>
    %165 = arith.mulf %161, %160 : vector<8x32xf32>
    %166 = arith.addf %164, %165 : vector<8x32xf32>
    %167 = math.tanh %166 : vector<8x32xf32>
    %168 = arith.mulf %163, %167 : vector<8x32xf32>
    %169 = vector.extract_strided_slice %10 {offsets = [32, 0], sizes = [8, 128], strides = [1, 1]} : vector<64x256xf32> to vector<8x128xf32>
    %cst_29 = arith.constant dense<0.000000e+00> : vector<8x128xf32>
    %170 = tpu.matmul %152, %11, %cst_29 {dimension_numbers = #tpu.dot_dimension_numbers<[1], [0], [0], [1], [0, 0, 1, 1], [], []>} : vector<8x32xf32>, vector<32x128xf32>, vector<8x128xf32> -> vector<8x128xf32>
    %171 = arith.addf %169, %170 : vector<8x128xf32>
    %172 = vector.extract_strided_slice %10 {offsets = [24, 128], sizes = [8, 128], strides = [1, 1]} : vector<64x256xf32> to vector<8x128xf32>
    %cst_30 = arith.constant dense<0.000000e+00> : vector<8x128xf32>
    %173 = tpu.matmul %168, %12, %cst_30 {dimension_numbers = #tpu.dot_dimension_numbers<[1], [0], [0], [1], [0, 0, 1, 1], [], []>} : vector<8x32xf32>, vector<32x128xf32>, vector<8x128xf32> -> vector<8x128xf32>
    %174 = arith.addf %172, %173 : vector<8x128xf32>
    %175 = vector.extract_strided_slice %171 {offsets = [0, 0], sizes = [8, 96], strides = [1, 1]} : vector<8x128xf32> to vector<8x96xf32>
    %176 = arith.negf %175 : vector<8x96xf32>
    %177 = math.exp %176 : vector<8x96xf32>
    %cst_31 = arith.constant 1.000000e+00 : f32
    %178 = vector.broadcast %cst_31 : f32 to vector<8x96xf32>
    %179 = arith.addf %178, %177 : vector<8x96xf32>
    %180 = arith.divf %178, %179 : vector<8x96xf32>
    %181 = vector.extract_strided_slice %171 {offsets = [0, 96], sizes = [8, 32], strides = [1, 1]} : vector<8x128xf32> to vector<8x32xf32>
    %182 = math.tanh %181 : vector<8x32xf32>
    %183 = vector.extract_strided_slice %180 {offsets = [0, 0], sizes = [8, 32], strides = [1, 1]} : vector<8x96xf32> to vector<8x32xf32>
    %184 = vector.extract_strided_slice %180 {offsets = [0, 32], sizes = [8, 32], strides = [1, 1]} : vector<8x96xf32> to vector<8x32xf32>
    %185 = vector.extract_strided_slice %180 {offsets = [0, 64], sizes = [8, 32], strides = [1, 1]} : vector<8x96xf32> to vector<8x32xf32>
    %186 = arith.mulf %184, %150 : vector<8x32xf32>
    %187 = arith.mulf %183, %182 : vector<8x32xf32>
    %188 = arith.addf %186, %187 : vector<8x32xf32>
    %189 = math.tanh %188 : vector<8x32xf32>
    %190 = arith.mulf %185, %189 : vector<8x32xf32>
    %191 = vector.extract_strided_slice %174 {offsets = [0, 0], sizes = [8, 96], strides = [1, 1]} : vector<8x128xf32> to vector<8x96xf32>
    %192 = arith.negf %191 : vector<8x96xf32>
    %193 = math.exp %192 : vector<8x96xf32>
    %cst_32 = arith.constant 1.000000e+00 : f32
    %194 = vector.broadcast %cst_32 : f32 to vector<8x96xf32>
    %195 = arith.addf %194, %193 : vector<8x96xf32>
    %196 = arith.divf %194, %195 : vector<8x96xf32>
    %197 = vector.extract_strided_slice %174 {offsets = [0, 96], sizes = [8, 32], strides = [1, 1]} : vector<8x128xf32> to vector<8x32xf32>
    %198 = math.tanh %197 : vector<8x32xf32>
    %199 = vector.extract_strided_slice %196 {offsets = [0, 0], sizes = [8, 32], strides = [1, 1]} : vector<8x96xf32> to vector<8x32xf32>
    %200 = vector.extract_strided_slice %196 {offsets = [0, 32], sizes = [8, 32], strides = [1, 1]} : vector<8x96xf32> to vector<8x32xf32>
    %201 = vector.extract_strided_slice %196 {offsets = [0, 64], sizes = [8, 32], strides = [1, 1]} : vector<8x96xf32> to vector<8x32xf32>
    %202 = arith.mulf %200, %166 : vector<8x32xf32>
    %203 = arith.mulf %199, %198 : vector<8x32xf32>
    %204 = arith.addf %202, %203 : vector<8x32xf32>
    %205 = math.tanh %204 : vector<8x32xf32>
    %206 = arith.mulf %201, %205 : vector<8x32xf32>
    %207 = vector.extract_strided_slice %10 {offsets = [40, 0], sizes = [8, 128], strides = [1, 1]} : vector<64x256xf32> to vector<8x128xf32>
    %cst_33 = arith.constant dense<0.000000e+00> : vector<8x128xf32>
    %208 = tpu.matmul %190, %11, %cst_33 {dimension_numbers = #tpu.dot_dimension_numbers<[1], [0], [0], [1], [0, 0, 1, 1], [], []>} : vector<8x32xf32>, vector<32x128xf32>, vector<8x128xf32> -> vector<8x128xf32>
    %209 = arith.addf %207, %208 : vector<8x128xf32>
    %210 = vector.extract_strided_slice %10 {offsets = [16, 128], sizes = [8, 128], strides = [1, 1]} : vector<64x256xf32> to vector<8x128xf32>
    %cst_34 = arith.constant dense<0.000000e+00> : vector<8x128xf32>
    %211 = tpu.matmul %206, %12, %cst_34 {dimension_numbers = #tpu.dot_dimension_numbers<[1], [0], [0], [1], [0, 0, 1, 1], [], []>} : vector<8x32xf32>, vector<32x128xf32>, vector<8x128xf32> -> vector<8x128xf32>
    %212 = arith.addf %210, %211 : vector<8x128xf32>
    %213 = vector.extract_strided_slice %209 {offsets = [0, 0], sizes = [8, 96], strides = [1, 1]} : vector<8x128xf32> to vector<8x96xf32>
    %214 = arith.negf %213 : vector<8x96xf32>
    %215 = math.exp %214 : vector<8x96xf32>
    %cst_35 = arith.constant 1.000000e+00 : f32
    %216 = vector.broadcast %cst_35 : f32 to vector<8x96xf32>
    %217 = arith.addf %216, %215 : vector<8x96xf32>
    %218 = arith.divf %216, %217 : vector<8x96xf32>
    %219 = vector.extract_strided_slice %209 {offsets = [0, 96], sizes = [8, 32], strides = [1, 1]} : vector<8x128xf32> to vector<8x32xf32>
    %220 = math.tanh %219 : vector<8x32xf32>
    %221 = vector.extract_strided_slice %218 {offsets = [0, 0], sizes = [8, 32], strides = [1, 1]} : vector<8x96xf32> to vector<8x32xf32>
    %222 = vector.extract_strided_slice %218 {offsets = [0, 32], sizes = [8, 32], strides = [1, 1]} : vector<8x96xf32> to vector<8x32xf32>
    %223 = vector.extract_strided_slice %218 {offsets = [0, 64], sizes = [8, 32], strides = [1, 1]} : vector<8x96xf32> to vector<8x32xf32>
    %224 = arith.mulf %222, %188 : vector<8x32xf32>
    %225 = arith.mulf %221, %220 : vector<8x32xf32>
    %226 = arith.addf %224, %225 : vector<8x32xf32>
    %227 = math.tanh %226 : vector<8x32xf32>
    %228 = arith.mulf %223, %227 : vector<8x32xf32>
    %229 = vector.extract_strided_slice %212 {offsets = [0, 0], sizes = [8, 96], strides = [1, 1]} : vector<8x128xf32> to vector<8x96xf32>
    %230 = arith.negf %229 : vector<8x96xf32>
    %231 = math.exp %230 : vector<8x96xf32>
    %cst_36 = arith.constant 1.000000e+00 : f32
    %232 = vector.broadcast %cst_36 : f32 to vector<8x96xf32>
    %233 = arith.addf %232, %231 : vector<8x96xf32>
    %234 = arith.divf %232, %233 : vector<8x96xf32>
    %235 = vector.extract_strided_slice %212 {offsets = [0, 96], sizes = [8, 32], strides = [1, 1]} : vector<8x128xf32> to vector<8x32xf32>
    %236 = math.tanh %235 : vector<8x32xf32>
    %237 = vector.extract_strided_slice %234 {offsets = [0, 0], sizes = [8, 32], strides = [1, 1]} : vector<8x96xf32> to vector<8x32xf32>
    %238 = vector.extract_strided_slice %234 {offsets = [0, 32], sizes = [8, 32], strides = [1, 1]} : vector<8x96xf32> to vector<8x32xf32>
    %239 = vector.extract_strided_slice %234 {offsets = [0, 64], sizes = [8, 32], strides = [1, 1]} : vector<8x96xf32> to vector<8x32xf32>
    %240 = arith.mulf %238, %204 : vector<8x32xf32>
    %241 = arith.mulf %237, %236 : vector<8x32xf32>
    %242 = arith.addf %240, %241 : vector<8x32xf32>
    %243 = math.tanh %242 : vector<8x32xf32>
    %244 = arith.mulf %239, %243 : vector<8x32xf32>
    %245 = vector.extract_strided_slice %10 {offsets = [48, 0], sizes = [8, 128], strides = [1, 1]} : vector<64x256xf32> to vector<8x128xf32>
    %cst_37 = arith.constant dense<0.000000e+00> : vector<8x128xf32>
    %246 = tpu.matmul %228, %11, %cst_37 {dimension_numbers = #tpu.dot_dimension_numbers<[1], [0], [0], [1], [0, 0, 1, 1], [], []>} : vector<8x32xf32>, vector<32x128xf32>, vector<8x128xf32> -> vector<8x128xf32>
    %247 = arith.addf %245, %246 : vector<8x128xf32>
    %248 = vector.extract_strided_slice %10 {offsets = [8, 128], sizes = [8, 128], strides = [1, 1]} : vector<64x256xf32> to vector<8x128xf32>
    %cst_38 = arith.constant dense<0.000000e+00> : vector<8x128xf32>
    %249 = tpu.matmul %244, %12, %cst_38 {dimension_numbers = #tpu.dot_dimension_numbers<[1], [0], [0], [1], [0, 0, 1, 1], [], []>} : vector<8x32xf32>, vector<32x128xf32>, vector<8x128xf32> -> vector<8x128xf32>
    %250 = arith.addf %248, %249 : vector<8x128xf32>
    %251 = vector.extract_strided_slice %247 {offsets = [0, 0], sizes = [8, 96], strides = [1, 1]} : vector<8x128xf32> to vector<8x96xf32>
    %252 = arith.negf %251 : vector<8x96xf32>
    %253 = math.exp %252 : vector<8x96xf32>
    %cst_39 = arith.constant 1.000000e+00 : f32
    %254 = vector.broadcast %cst_39 : f32 to vector<8x96xf32>
    %255 = arith.addf %254, %253 : vector<8x96xf32>
    %256 = arith.divf %254, %255 : vector<8x96xf32>
    %257 = vector.extract_strided_slice %247 {offsets = [0, 96], sizes = [8, 32], strides = [1, 1]} : vector<8x128xf32> to vector<8x32xf32>
    %258 = math.tanh %257 : vector<8x32xf32>
    %259 = vector.extract_strided_slice %256 {offsets = [0, 0], sizes = [8, 32], strides = [1, 1]} : vector<8x96xf32> to vector<8x32xf32>
    %260 = vector.extract_strided_slice %256 {offsets = [0, 32], sizes = [8, 32], strides = [1, 1]} : vector<8x96xf32> to vector<8x32xf32>
    %261 = vector.extract_strided_slice %256 {offsets = [0, 64], sizes = [8, 32], strides = [1, 1]} : vector<8x96xf32> to vector<8x32xf32>
    %262 = arith.mulf %260, %226 : vector<8x32xf32>
    %263 = arith.mulf %259, %258 : vector<8x32xf32>
    %264 = arith.addf %262, %263 : vector<8x32xf32>
    %265 = math.tanh %264 : vector<8x32xf32>
    %266 = arith.mulf %261, %265 : vector<8x32xf32>
    %267 = vector.extract_strided_slice %250 {offsets = [0, 0], sizes = [8, 96], strides = [1, 1]} : vector<8x128xf32> to vector<8x96xf32>
    %268 = arith.negf %267 : vector<8x96xf32>
    %269 = math.exp %268 : vector<8x96xf32>
    %cst_40 = arith.constant 1.000000e+00 : f32
    %270 = vector.broadcast %cst_40 : f32 to vector<8x96xf32>
    %271 = arith.addf %270, %269 : vector<8x96xf32>
    %272 = arith.divf %270, %271 : vector<8x96xf32>
    %273 = vector.extract_strided_slice %250 {offsets = [0, 96], sizes = [8, 32], strides = [1, 1]} : vector<8x128xf32> to vector<8x32xf32>
    %274 = math.tanh %273 : vector<8x32xf32>
    %275 = vector.extract_strided_slice %272 {offsets = [0, 0], sizes = [8, 32], strides = [1, 1]} : vector<8x96xf32> to vector<8x32xf32>
    %276 = vector.extract_strided_slice %272 {offsets = [0, 32], sizes = [8, 32], strides = [1, 1]} : vector<8x96xf32> to vector<8x32xf32>
    %277 = vector.extract_strided_slice %272 {offsets = [0, 64], sizes = [8, 32], strides = [1, 1]} : vector<8x96xf32> to vector<8x32xf32>
    %278 = arith.mulf %276, %242 : vector<8x32xf32>
    %279 = arith.mulf %275, %274 : vector<8x32xf32>
    %280 = arith.addf %278, %279 : vector<8x32xf32>
    %281 = math.tanh %280 : vector<8x32xf32>
    %282 = arith.mulf %277, %281 : vector<8x32xf32>
    %283 = vector.extract_strided_slice %10 {offsets = [56, 0], sizes = [8, 128], strides = [1, 1]} : vector<64x256xf32> to vector<8x128xf32>
    %cst_41 = arith.constant dense<0.000000e+00> : vector<8x128xf32>
    %284 = tpu.matmul %266, %11, %cst_41 {dimension_numbers = #tpu.dot_dimension_numbers<[1], [0], [0], [1], [0, 0, 1, 1], [], []>} : vector<8x32xf32>, vector<32x128xf32>, vector<8x128xf32> -> vector<8x128xf32>
    %285 = arith.addf %283, %284 : vector<8x128xf32>
    %286 = vector.extract_strided_slice %10 {offsets = [0, 128], sizes = [8, 128], strides = [1, 1]} : vector<64x256xf32> to vector<8x128xf32>
    %cst_42 = arith.constant dense<0.000000e+00> : vector<8x128xf32>
    %287 = tpu.matmul %282, %12, %cst_42 {dimension_numbers = #tpu.dot_dimension_numbers<[1], [0], [0], [1], [0, 0, 1, 1], [], []>} : vector<8x32xf32>, vector<32x128xf32>, vector<8x128xf32> -> vector<8x128xf32>
    %288 = arith.addf %286, %287 : vector<8x128xf32>
    %289 = vector.extract_strided_slice %285 {offsets = [0, 0], sizes = [8, 96], strides = [1, 1]} : vector<8x128xf32> to vector<8x96xf32>
    %290 = arith.negf %289 : vector<8x96xf32>
    %291 = math.exp %290 : vector<8x96xf32>
    %cst_43 = arith.constant 1.000000e+00 : f32
    %292 = vector.broadcast %cst_43 : f32 to vector<8x96xf32>
    %293 = arith.addf %292, %291 : vector<8x96xf32>
    %294 = arith.divf %292, %293 : vector<8x96xf32>
    %295 = vector.extract_strided_slice %285 {offsets = [0, 96], sizes = [8, 32], strides = [1, 1]} : vector<8x128xf32> to vector<8x32xf32>
    %296 = math.tanh %295 : vector<8x32xf32>
    %297 = vector.extract_strided_slice %294 {offsets = [0, 0], sizes = [8, 32], strides = [1, 1]} : vector<8x96xf32> to vector<8x32xf32>
    %298 = vector.extract_strided_slice %294 {offsets = [0, 32], sizes = [8, 32], strides = [1, 1]} : vector<8x96xf32> to vector<8x32xf32>
    %299 = vector.extract_strided_slice %294 {offsets = [0, 64], sizes = [8, 32], strides = [1, 1]} : vector<8x96xf32> to vector<8x32xf32>
    %300 = arith.mulf %298, %264 : vector<8x32xf32>
    %301 = arith.mulf %297, %296 : vector<8x32xf32>
    %302 = arith.addf %300, %301 : vector<8x32xf32>
    %303 = math.tanh %302 : vector<8x32xf32>
    %304 = arith.mulf %299, %303 : vector<8x32xf32>
    %305 = vector.extract_strided_slice %288 {offsets = [0, 0], sizes = [8, 96], strides = [1, 1]} : vector<8x128xf32> to vector<8x96xf32>
    %306 = arith.negf %305 : vector<8x96xf32>
    %307 = math.exp %306 : vector<8x96xf32>
    %cst_44 = arith.constant 1.000000e+00 : f32
    %308 = vector.broadcast %cst_44 : f32 to vector<8x96xf32>
    %309 = arith.addf %308, %307 : vector<8x96xf32>
    %310 = arith.divf %308, %309 : vector<8x96xf32>
    %311 = vector.extract_strided_slice %288 {offsets = [0, 96], sizes = [8, 32], strides = [1, 1]} : vector<8x128xf32> to vector<8x32xf32>
    %312 = math.tanh %311 : vector<8x32xf32>
    %313 = vector.extract_strided_slice %310 {offsets = [0, 0], sizes = [8, 32], strides = [1, 1]} : vector<8x96xf32> to vector<8x32xf32>
    %314 = vector.extract_strided_slice %310 {offsets = [0, 32], sizes = [8, 32], strides = [1, 1]} : vector<8x96xf32> to vector<8x32xf32>
    %315 = vector.extract_strided_slice %310 {offsets = [0, 64], sizes = [8, 32], strides = [1, 1]} : vector<8x96xf32> to vector<8x32xf32>
    %316 = arith.mulf %314, %280 : vector<8x32xf32>
    %317 = arith.mulf %313, %312 : vector<8x32xf32>
    %318 = arith.addf %316, %317 : vector<8x32xf32>
    %319 = math.tanh %318 : vector<8x32xf32>
    %320 = arith.mulf %315, %319 : vector<8x32xf32>
    %321 = tpu.concatenate %38, %76, %114, %152, %190, %228, %266, %304 in 0 : vector<8x32xf32>, vector<8x32xf32>, vector<8x32xf32>, vector<8x32xf32>, vector<8x32xf32>, vector<8x32xf32>, vector<8x32xf32>, vector<8x32xf32> -> vector<64x32xf32>
    %322 = tpu.concatenate %320, %282, %244, %206, %168, %130, %92, %54 in 0 : vector<8x32xf32>, vector<8x32xf32>, vector<8x32xf32>, vector<8x32xf32>, vector<8x32xf32>, vector<8x32xf32>, vector<8x32xf32>, vector<8x32xf32> -> vector<64x32xf32>
    %c0_45 = arith.constant 0 : index
    %c0_46 = arith.constant 0 : index
    %323 = vector.load %arg5[%c0_45, %c0_46] : memref<32x256xf32, #tpu.memory_space<vmem>>, vector<32x256xf32>
    %cst_47 = arith.constant dense<0.000000e+00> : vector<64x256xf32>
    %324 = tpu.matmul %321, %323, %cst_47 {dimension_numbers = #tpu.dot_dimension_numbers<[1], [0], [0], [1], [0, 0, 1, 1], [], []>} : vector<64x32xf32>, vector<32x256xf32>, vector<64x256xf32> -> vector<64x256xf32>
    %c0_48 = arith.constant 0 : index
    %c0_49 = arith.constant 0 : index
    %325 = vector.load %arg6[%c0_48, %c0_49] : memref<32x256xf32, #tpu.memory_space<vmem>>, vector<32x256xf32>
    %cst_50 = arith.constant dense<0.000000e+00> : vector<64x256xf32>
    %326 = tpu.matmul %322, %325, %cst_50 {dimension_numbers = #tpu.dot_dimension_numbers<[1], [0], [0], [1], [0, 0, 1, 1], [], []>} : vector<64x32xf32>, vector<32x256xf32>, vector<64x256xf32> -> vector<64x256xf32>
    %327 = arith.addf %324, %326 : vector<64x256xf32>
    %c0_51 = arith.constant 0 : index
    %c0_52 = arith.constant 0 : index
    %328 = vector.load %arg7[%c0_51, %c0_52] : memref<1x256xf32, #tpu.memory_space<vmem>>, vector<1x256xf32>
    %329 = vector.broadcast %328 : vector<1x256xf32> to vector<64x256xf32>
    %330 = arith.addf %327, %329 : vector<64x256xf32>
    %c0_53 = arith.constant 0 : index
    %c0_54 = arith.constant 0 : index
    %331 = vector.load %arg8[%c0_53, %c0_54] : memref<32x128xf32, #tpu.memory_space<vmem>>, vector<32x128xf32>
    %c0_55 = arith.constant 0 : index
    %c0_56 = arith.constant 0 : index
    %332 = vector.load %arg9[%c0_55, %c0_56] : memref<32x128xf32, #tpu.memory_space<vmem>>, vector<32x128xf32>
    %cst_57 = arith.constant 0.000000e+00 : f32
    %333 = vector.broadcast %cst_57 : f32 to vector<8x32xf32>
    %cst_58 = arith.constant 0.000000e+00 : f32
    %334 = vector.broadcast %cst_58 : f32 to vector<8x32xf32>
    %cst_59 = arith.constant 0.000000e+00 : f32
    %335 = vector.broadcast %cst_59 : f32 to vector<8x32xf32>
    %cst_60 = arith.constant 0.000000e+00 : f32
    %336 = vector.broadcast %cst_60 : f32 to vector<8x32xf32>
    %337 = vector.extract_strided_slice %330 {offsets = [0, 0], sizes = [8, 128], strides = [1, 1]} : vector<64x256xf32> to vector<8x128xf32>
    %cst_61 = arith.constant dense<0.000000e+00> : vector<8x128xf32>
    %338 = tpu.matmul %333, %331, %cst_61 {dimension_numbers = #tpu.dot_dimension_numbers<[1], [0], [0], [1], [0, 0, 1, 1], [], []>} : vector<8x32xf32>, vector<32x128xf32>, vector<8x128xf32> -> vector<8x128xf32>
    %339 = arith.addf %337, %338 : vector<8x128xf32>
    %340 = vector.extract_strided_slice %330 {offsets = [56, 128], sizes = [8, 128], strides = [1, 1]} : vector<64x256xf32> to vector<8x128xf32>
    %cst_62 = arith.constant dense<0.000000e+00> : vector<8x128xf32>
    %341 = tpu.matmul %335, %332, %cst_62 {dimension_numbers = #tpu.dot_dimension_numbers<[1], [0], [0], [1], [0, 0, 1, 1], [], []>} : vector<8x32xf32>, vector<32x128xf32>, vector<8x128xf32> -> vector<8x128xf32>
    %342 = arith.addf %340, %341 : vector<8x128xf32>
    %343 = vector.extract_strided_slice %339 {offsets = [0, 0], sizes = [8, 96], strides = [1, 1]} : vector<8x128xf32> to vector<8x96xf32>
    %344 = arith.negf %343 : vector<8x96xf32>
    %345 = math.exp %344 : vector<8x96xf32>
    %cst_63 = arith.constant 1.000000e+00 : f32
    %346 = vector.broadcast %cst_63 : f32 to vector<8x96xf32>
    %347 = arith.addf %346, %345 : vector<8x96xf32>
    %348 = arith.divf %346, %347 : vector<8x96xf32>
    %349 = vector.extract_strided_slice %339 {offsets = [0, 96], sizes = [8, 32], strides = [1, 1]} : vector<8x128xf32> to vector<8x32xf32>
    %350 = math.tanh %349 : vector<8x32xf32>
    %351 = vector.extract_strided_slice %348 {offsets = [0, 0], sizes = [8, 32], strides = [1, 1]} : vector<8x96xf32> to vector<8x32xf32>
    %352 = vector.extract_strided_slice %348 {offsets = [0, 32], sizes = [8, 32], strides = [1, 1]} : vector<8x96xf32> to vector<8x32xf32>
    %353 = vector.extract_strided_slice %348 {offsets = [0, 64], sizes = [8, 32], strides = [1, 1]} : vector<8x96xf32> to vector<8x32xf32>
    %354 = arith.mulf %352, %334 : vector<8x32xf32>
    %355 = arith.mulf %351, %350 : vector<8x32xf32>
    %356 = arith.addf %354, %355 : vector<8x32xf32>
    %357 = math.tanh %356 : vector<8x32xf32>
    %358 = arith.mulf %353, %357 : vector<8x32xf32>
    %359 = vector.extract_strided_slice %342 {offsets = [0, 0], sizes = [8, 96], strides = [1, 1]} : vector<8x128xf32> to vector<8x96xf32>
    %360 = arith.negf %359 : vector<8x96xf32>
    %361 = math.exp %360 : vector<8x96xf32>
    %cst_64 = arith.constant 1.000000e+00 : f32
    %362 = vector.broadcast %cst_64 : f32 to vector<8x96xf32>
    %363 = arith.addf %362, %361 : vector<8x96xf32>
    %364 = arith.divf %362, %363 : vector<8x96xf32>
    %365 = vector.extract_strided_slice %342 {offsets = [0, 96], sizes = [8, 32], strides = [1, 1]} : vector<8x128xf32> to vector<8x32xf32>
    %366 = math.tanh %365 : vector<8x32xf32>
    %367 = vector.extract_strided_slice %364 {offsets = [0, 0], sizes = [8, 32], strides = [1, 1]} : vector<8x96xf32> to vector<8x32xf32>
    %368 = vector.extract_strided_slice %364 {offsets = [0, 32], sizes = [8, 32], strides = [1, 1]} : vector<8x96xf32> to vector<8x32xf32>
    %369 = vector.extract_strided_slice %364 {offsets = [0, 64], sizes = [8, 32], strides = [1, 1]} : vector<8x96xf32> to vector<8x32xf32>
    %370 = arith.mulf %368, %336 : vector<8x32xf32>
    %371 = arith.mulf %367, %366 : vector<8x32xf32>
    %372 = arith.addf %370, %371 : vector<8x32xf32>
    %373 = math.tanh %372 : vector<8x32xf32>
    %374 = arith.mulf %369, %373 : vector<8x32xf32>
    %375 = vector.extract_strided_slice %330 {offsets = [8, 0], sizes = [8, 128], strides = [1, 1]} : vector<64x256xf32> to vector<8x128xf32>
    %cst_65 = arith.constant dense<0.000000e+00> : vector<8x128xf32>
    %376 = tpu.matmul %358, %331, %cst_65 {dimension_numbers = #tpu.dot_dimension_numbers<[1], [0], [0], [1], [0, 0, 1, 1], [], []>} : vector<8x32xf32>, vector<32x128xf32>, vector<8x128xf32> -> vector<8x128xf32>
    %377 = arith.addf %375, %376 : vector<8x128xf32>
    %378 = vector.extract_strided_slice %377 {offsets = [0, 0], sizes = [8, 96], strides = [1, 1]} : vector<8x128xf32> to vector<8x96xf32>
    %379 = arith.negf %378 : vector<8x96xf32>
    %380 = math.exp %379 : vector<8x96xf32>
    %cst_66 = arith.constant 1.000000e+00 : f32
    %381 = vector.broadcast %cst_66 : f32 to vector<8x96xf32>
    %382 = arith.addf %381, %380 : vector<8x96xf32>
    %383 = arith.divf %381, %382 : vector<8x96xf32>
    %384 = vector.extract_strided_slice %377 {offsets = [0, 96], sizes = [8, 32], strides = [1, 1]} : vector<8x128xf32> to vector<8x32xf32>
    %385 = math.tanh %384 : vector<8x32xf32>
    %386 = vector.extract_strided_slice %383 {offsets = [0, 0], sizes = [8, 32], strides = [1, 1]} : vector<8x96xf32> to vector<8x32xf32>
    %387 = vector.extract_strided_slice %383 {offsets = [0, 32], sizes = [8, 32], strides = [1, 1]} : vector<8x96xf32> to vector<8x32xf32>
    %388 = vector.extract_strided_slice %383 {offsets = [0, 64], sizes = [8, 32], strides = [1, 1]} : vector<8x96xf32> to vector<8x32xf32>
    %389 = arith.mulf %387, %356 : vector<8x32xf32>
    %390 = arith.mulf %386, %385 : vector<8x32xf32>
    %391 = arith.addf %389, %390 : vector<8x32xf32>
    %392 = math.tanh %391 : vector<8x32xf32>
    %393 = arith.mulf %388, %392 : vector<8x32xf32>
    %394 = vector.extract_strided_slice %330 {offsets = [16, 0], sizes = [8, 128], strides = [1, 1]} : vector<64x256xf32> to vector<8x128xf32>
    %cst_67 = arith.constant dense<0.000000e+00> : vector<8x128xf32>
    %395 = tpu.matmul %393, %331, %cst_67 {dimension_numbers = #tpu.dot_dimension_numbers<[1], [0], [0], [1], [0, 0, 1, 1], [], []>} : vector<8x32xf32>, vector<32x128xf32>, vector<8x128xf32> -> vector<8x128xf32>
    %396 = arith.addf %394, %395 : vector<8x128xf32>
    %397 = vector.extract_strided_slice %396 {offsets = [0, 0], sizes = [8, 96], strides = [1, 1]} : vector<8x128xf32> to vector<8x96xf32>
    %398 = arith.negf %397 : vector<8x96xf32>
    %399 = math.exp %398 : vector<8x96xf32>
    %cst_68 = arith.constant 1.000000e+00 : f32
    %400 = vector.broadcast %cst_68 : f32 to vector<8x96xf32>
    %401 = arith.addf %400, %399 : vector<8x96xf32>
    %402 = arith.divf %400, %401 : vector<8x96xf32>
    %403 = vector.extract_strided_slice %396 {offsets = [0, 96], sizes = [8, 32], strides = [1, 1]} : vector<8x128xf32> to vector<8x32xf32>
    %404 = math.tanh %403 : vector<8x32xf32>
    %405 = vector.extract_strided_slice %402 {offsets = [0, 0], sizes = [8, 32], strides = [1, 1]} : vector<8x96xf32> to vector<8x32xf32>
    %406 = vector.extract_strided_slice %402 {offsets = [0, 32], sizes = [8, 32], strides = [1, 1]} : vector<8x96xf32> to vector<8x32xf32>
    %407 = vector.extract_strided_slice %402 {offsets = [0, 64], sizes = [8, 32], strides = [1, 1]} : vector<8x96xf32> to vector<8x32xf32>
    %408 = arith.mulf %406, %391 : vector<8x32xf32>
    %409 = arith.mulf %405, %404 : vector<8x32xf32>
    %410 = arith.addf %408, %409 : vector<8x32xf32>
    %411 = math.tanh %410 : vector<8x32xf32>
    %412 = arith.mulf %407, %411 : vector<8x32xf32>
    %413 = vector.extract_strided_slice %330 {offsets = [24, 0], sizes = [8, 128], strides = [1, 1]} : vector<64x256xf32> to vector<8x128xf32>
    %cst_69 = arith.constant dense<0.000000e+00> : vector<8x128xf32>
    %414 = tpu.matmul %412, %331, %cst_69 {dimension_numbers = #tpu.dot_dimension_numbers<[1], [0], [0], [1], [0, 0, 1, 1], [], []>} : vector<8x32xf32>, vector<32x128xf32>, vector<8x128xf32> -> vector<8x128xf32>
    %415 = arith.addf %413, %414 : vector<8x128xf32>
    %416 = vector.extract_strided_slice %415 {offsets = [0, 0], sizes = [8, 96], strides = [1, 1]} : vector<8x128xf32> to vector<8x96xf32>
    %417 = arith.negf %416 : vector<8x96xf32>
    %418 = math.exp %417 : vector<8x96xf32>
    %cst_70 = arith.constant 1.000000e+00 : f32
    %419 = vector.broadcast %cst_70 : f32 to vector<8x96xf32>
    %420 = arith.addf %419, %418 : vector<8x96xf32>
    %421 = arith.divf %419, %420 : vector<8x96xf32>
    %422 = vector.extract_strided_slice %415 {offsets = [0, 96], sizes = [8, 32], strides = [1, 1]} : vector<8x128xf32> to vector<8x32xf32>
    %423 = math.tanh %422 : vector<8x32xf32>
    %424 = vector.extract_strided_slice %421 {offsets = [0, 0], sizes = [8, 32], strides = [1, 1]} : vector<8x96xf32> to vector<8x32xf32>
    %425 = vector.extract_strided_slice %421 {offsets = [0, 32], sizes = [8, 32], strides = [1, 1]} : vector<8x96xf32> to vector<8x32xf32>
    %426 = vector.extract_strided_slice %421 {offsets = [0, 64], sizes = [8, 32], strides = [1, 1]} : vector<8x96xf32> to vector<8x32xf32>
    %427 = arith.mulf %425, %410 : vector<8x32xf32>
    %428 = arith.mulf %424, %423 : vector<8x32xf32>
    %429 = arith.addf %427, %428 : vector<8x32xf32>
    %430 = math.tanh %429 : vector<8x32xf32>
    %431 = arith.mulf %426, %430 : vector<8x32xf32>
    %432 = vector.extract_strided_slice %330 {offsets = [32, 0], sizes = [8, 128], strides = [1, 1]} : vector<64x256xf32> to vector<8x128xf32>
    %cst_71 = arith.constant dense<0.000000e+00> : vector<8x128xf32>
    %433 = tpu.matmul %431, %331, %cst_71 {dimension_numbers = #tpu.dot_dimension_numbers<[1], [0], [0], [1], [0, 0, 1, 1], [], []>} : vector<8x32xf32>, vector<32x128xf32>, vector<8x128xf32> -> vector<8x128xf32>
    %434 = arith.addf %432, %433 : vector<8x128xf32>
    %435 = vector.extract_strided_slice %434 {offsets = [0, 0], sizes = [8, 96], strides = [1, 1]} : vector<8x128xf32> to vector<8x96xf32>
    %436 = arith.negf %435 : vector<8x96xf32>
    %437 = math.exp %436 : vector<8x96xf32>
    %cst_72 = arith.constant 1.000000e+00 : f32
    %438 = vector.broadcast %cst_72 : f32 to vector<8x96xf32>
    %439 = arith.addf %438, %437 : vector<8x96xf32>
    %440 = arith.divf %438, %439 : vector<8x96xf32>
    %441 = vector.extract_strided_slice %434 {offsets = [0, 96], sizes = [8, 32], strides = [1, 1]} : vector<8x128xf32> to vector<8x32xf32>
    %442 = math.tanh %441 : vector<8x32xf32>
    %443 = vector.extract_strided_slice %440 {offsets = [0, 0], sizes = [8, 32], strides = [1, 1]} : vector<8x96xf32> to vector<8x32xf32>
    %444 = vector.extract_strided_slice %440 {offsets = [0, 32], sizes = [8, 32], strides = [1, 1]} : vector<8x96xf32> to vector<8x32xf32>
    %445 = vector.extract_strided_slice %440 {offsets = [0, 64], sizes = [8, 32], strides = [1, 1]} : vector<8x96xf32> to vector<8x32xf32>
    %446 = arith.mulf %444, %429 : vector<8x32xf32>
    %447 = arith.mulf %443, %442 : vector<8x32xf32>
    %448 = arith.addf %446, %447 : vector<8x32xf32>
    %449 = math.tanh %448 : vector<8x32xf32>
    %450 = arith.mulf %445, %449 : vector<8x32xf32>
    %451 = vector.extract_strided_slice %330 {offsets = [40, 0], sizes = [8, 128], strides = [1, 1]} : vector<64x256xf32> to vector<8x128xf32>
    %cst_73 = arith.constant dense<0.000000e+00> : vector<8x128xf32>
    %452 = tpu.matmul %450, %331, %cst_73 {dimension_numbers = #tpu.dot_dimension_numbers<[1], [0], [0], [1], [0, 0, 1, 1], [], []>} : vector<8x32xf32>, vector<32x128xf32>, vector<8x128xf32> -> vector<8x128xf32>
    %453 = arith.addf %451, %452 : vector<8x128xf32>
    %454 = vector.extract_strided_slice %453 {offsets = [0, 0], sizes = [8, 96], strides = [1, 1]} : vector<8x128xf32> to vector<8x96xf32>
    %455 = arith.negf %454 : vector<8x96xf32>
    %456 = math.exp %455 : vector<8x96xf32>
    %cst_74 = arith.constant 1.000000e+00 : f32
    %457 = vector.broadcast %cst_74 : f32 to vector<8x96xf32>
    %458 = arith.addf %457, %456 : vector<8x96xf32>
    %459 = arith.divf %457, %458 : vector<8x96xf32>
    %460 = vector.extract_strided_slice %453 {offsets = [0, 96], sizes = [8, 32], strides = [1, 1]} : vector<8x128xf32> to vector<8x32xf32>
    %461 = math.tanh %460 : vector<8x32xf32>
    %462 = vector.extract_strided_slice %459 {offsets = [0, 0], sizes = [8, 32], strides = [1, 1]} : vector<8x96xf32> to vector<8x32xf32>
    %463 = vector.extract_strided_slice %459 {offsets = [0, 32], sizes = [8, 32], strides = [1, 1]} : vector<8x96xf32> to vector<8x32xf32>
    %464 = vector.extract_strided_slice %459 {offsets = [0, 64], sizes = [8, 32], strides = [1, 1]} : vector<8x96xf32> to vector<8x32xf32>
    %465 = arith.mulf %463, %448 : vector<8x32xf32>
    %466 = arith.mulf %462, %461 : vector<8x32xf32>
    %467 = arith.addf %465, %466 : vector<8x32xf32>
    %468 = math.tanh %467 : vector<8x32xf32>
    %469 = arith.mulf %464, %468 : vector<8x32xf32>
    %470 = vector.extract_strided_slice %330 {offsets = [48, 0], sizes = [8, 128], strides = [1, 1]} : vector<64x256xf32> to vector<8x128xf32>
    %cst_75 = arith.constant dense<0.000000e+00> : vector<8x128xf32>
    %471 = tpu.matmul %469, %331, %cst_75 {dimension_numbers = #tpu.dot_dimension_numbers<[1], [0], [0], [1], [0, 0, 1, 1], [], []>} : vector<8x32xf32>, vector<32x128xf32>, vector<8x128xf32> -> vector<8x128xf32>
    %472 = arith.addf %470, %471 : vector<8x128xf32>
    %473 = vector.extract_strided_slice %472 {offsets = [0, 0], sizes = [8, 96], strides = [1, 1]} : vector<8x128xf32> to vector<8x96xf32>
    %474 = arith.negf %473 : vector<8x96xf32>
    %475 = math.exp %474 : vector<8x96xf32>
    %cst_76 = arith.constant 1.000000e+00 : f32
    %476 = vector.broadcast %cst_76 : f32 to vector<8x96xf32>
    %477 = arith.addf %476, %475 : vector<8x96xf32>
    %478 = arith.divf %476, %477 : vector<8x96xf32>
    %479 = vector.extract_strided_slice %472 {offsets = [0, 96], sizes = [8, 32], strides = [1, 1]} : vector<8x128xf32> to vector<8x32xf32>
    %480 = math.tanh %479 : vector<8x32xf32>
    %481 = vector.extract_strided_slice %478 {offsets = [0, 0], sizes = [8, 32], strides = [1, 1]} : vector<8x96xf32> to vector<8x32xf32>
    %482 = vector.extract_strided_slice %478 {offsets = [0, 32], sizes = [8, 32], strides = [1, 1]} : vector<8x96xf32> to vector<8x32xf32>
    %483 = vector.extract_strided_slice %478 {offsets = [0, 64], sizes = [8, 32], strides = [1, 1]} : vector<8x96xf32> to vector<8x32xf32>
    %484 = arith.mulf %482, %467 : vector<8x32xf32>
    %485 = arith.mulf %481, %480 : vector<8x32xf32>
    %486 = arith.addf %484, %485 : vector<8x32xf32>
    %487 = math.tanh %486 : vector<8x32xf32>
    %488 = arith.mulf %483, %487 : vector<8x32xf32>
    %489 = vector.extract_strided_slice %330 {offsets = [56, 0], sizes = [8, 128], strides = [1, 1]} : vector<64x256xf32> to vector<8x128xf32>
    %cst_77 = arith.constant dense<0.000000e+00> : vector<8x128xf32>
    %490 = tpu.matmul %488, %331, %cst_77 {dimension_numbers = #tpu.dot_dimension_numbers<[1], [0], [0], [1], [0, 0, 1, 1], [], []>} : vector<8x32xf32>, vector<32x128xf32>, vector<8x128xf32> -> vector<8x128xf32>
    %491 = arith.addf %489, %490 : vector<8x128xf32>
    %492 = vector.extract_strided_slice %491 {offsets = [0, 0], sizes = [8, 96], strides = [1, 1]} : vector<8x128xf32> to vector<8x96xf32>
    %493 = arith.negf %492 : vector<8x96xf32>
    %494 = math.exp %493 : vector<8x96xf32>
    %cst_78 = arith.constant 1.000000e+00 : f32
    %495 = vector.broadcast %cst_78 : f32 to vector<8x96xf32>
    %496 = arith.addf %495, %494 : vector<8x96xf32>
    %497 = arith.divf %495, %496 : vector<8x96xf32>
    %498 = vector.extract_strided_slice %491 {offsets = [0, 96], sizes = [8, 32], strides = [1, 1]} : vector<8x128xf32> to vector<8x32xf32>
    %499 = math.tanh %498 : vector<8x32xf32>
    %500 = vector.extract_strided_slice %497 {offsets = [0, 0], sizes = [8, 32], strides = [1, 1]} : vector<8x96xf32> to vector<8x32xf32>
    %501 = vector.extract_strided_slice %497 {offsets = [0, 32], sizes = [8, 32], strides = [1, 1]} : vector<8x96xf32> to vector<8x32xf32>
    %502 = vector.extract_strided_slice %497 {offsets = [0, 64], sizes = [8, 32], strides = [1, 1]} : vector<8x96xf32> to vector<8x32xf32>
    %503 = arith.mulf %501, %486 : vector<8x32xf32>
    %504 = arith.mulf %500, %499 : vector<8x32xf32>
    %505 = arith.addf %503, %504 : vector<8x32xf32>
    %506 = math.tanh %505 : vector<8x32xf32>
    %507 = arith.mulf %502, %506 : vector<8x32xf32>
    %c0_79 = arith.constant 0 : index
    %c0_80 = arith.constant 0 : index
    %508 = vector.load %arg10[%c0_79, %c0_80] : memref<1x64xf32, #tpu.memory_space<vmem>>, vector<1x32xf32>
    %509 = vector.broadcast %508 : vector<1x32xf32> to vector<8x32xf32>
    %510 = arith.mulf %507, %509 : vector<8x32xf32>
    %cst_81 = arith.constant dense<0.000000e+00> : vector<8xf32>
    %511 = vector.multi_reduction <add>, %510, %cst_81 [1] : vector<8x32xf32> to vector<8xf32>
    %512 = vector.shape_cast %511 : vector<8xf32> to vector<8x1xf32>
    %c0_82 = arith.constant 0 : index
    %c32 = arith.constant 32 : index
    %513 = vector.load %arg10[%c0_82, %c32] : memref<1x64xf32, #tpu.memory_space<vmem>>, vector<1x32xf32>
    %514 = vector.broadcast %513 : vector<1x32xf32> to vector<8x32xf32>
    %515 = arith.mulf %374, %514 : vector<8x32xf32>
    %cst_83 = arith.constant dense<0.000000e+00> : vector<8xf32>
    %516 = vector.multi_reduction <add>, %515, %cst_83 [1] : vector<8x32xf32> to vector<8xf32>
    %517 = vector.shape_cast %516 : vector<8xf32> to vector<8x1xf32>
    %518 = arith.addf %512, %517 : vector<8x1xf32>
    %c0_84 = arith.constant 0 : index
    %c0_85 = arith.constant 0 : index
    %519 = vector.load %arg11[%c0_84, %c0_85] : memref<1x1xf32, #tpu.memory_space<vmem>>, vector<1x1xf32>
    %520 = vector.broadcast %519 : vector<1x1xf32> to vector<8x1xf32>
    %521 = arith.addf %518, %520 : vector<8x1xf32>
    %522 = arith.negf %521 : vector<8x1xf32>
    %523 = math.exp %522 : vector<8x1xf32>
    %cst_86 = arith.constant 1.000000e+00 : f32
    %524 = vector.broadcast %cst_86 : f32 to vector<8x1xf32>
    %525 = arith.addf %524, %523 : vector<8x1xf32>
    %526 = arith.divf %524, %525 : vector<8x1xf32>
    %c0_87 = arith.constant 0 : index
    %c0_88 = arith.constant 0 : index
    %527 = vector.load %arg12[%c0_87, %c0_88] : memref<8x1xf32, #tpu.memory_space<vmem>>, vector<8x1xf32>
    tpu.vector_store %arg12[%c0_87, %c0_88], %526 {strides = array<i32>} : memref<8x1xf32, #tpu.memory_space<vmem>>, vector<8x1xf32>,
    return
  }
}

</mosaic_0001>

<bundles_post_ra>
// kernel: tpu_custom_call.1
= control target key start
LH: loop header
LB: loop body
LE: loop exit
PB: predicated region body
PF: predicated region fallthrough
CT: control target
= control target key end

     0   :  { %s4962_s0 = inlined_call_operand.vmem [shape: s32[64,1], index: 0, kind: input, shape index: {}]   ;;  %s4963_s1 = inlined_call_operand.hbm [shape: f32[20,256], index: 1, kind: input, shape index: {}]   ;;  %s4964_s2 = inlined_call_operand.vmem [shape: f32[1,256], index: 2, kind: input, shape index: {}]   ;;  %s4965_s3 = inlined_call_operand.hbm [shape: f32[32,128], index: 3, kind: input, shape index: {}]   ;;  %s4966_s4 = inlined_call_operand.hbm [shape: f32[32,128], index: 4, kind: input, shape index: {}]   ;;  %s4967_s5 = inlined_call_operand.vmem [shape: f32[32,256], index: 5, kind: input, shape index: {}]   ;;  %s4968_s6 = inlined_call_operand.hbm [shape: f32[32,256], index: 6, kind: input, shape index: {}]   ;;  %s4969_s7 = inlined_call_operand.hbm [shape: f32[1,256], index: 7, kind: input, shape index: {}]   ;;  %s4970_s8 = inlined_call_operand.vmem [shape: f32[32,128], index: 8, kind: input, shape index: {}]   ;;  %s4971_s9 = inlined_call_operand.hbm [shape: f32[32,128], index: 9, kind: input, shape index: {}]   ;;  %s4972_s10 = inlined_call_operand.vmem [shape: f32[1,64], index: 10, kind: input, shape index: {}]   ;;  %s4973_s11 = inlined_call_operand.<no memory space> [shape: f32[1,1], index: 11, kind: input, shape index: {}]   ;;  %s4974_s12 = inlined_call_operand.vmem [shape: f32[8,1], index: 12, kind: output, shape index: {}]  }
   0x1   :  { %v17_v0 = vstv %s4973_s11 }
   0x2   :  { %18 = vst [vmem:[#allocation2] sm:$0x1] %v17_v0 }
   0x3   :  { %19 = vsyncpa [#allocation4], 0 }
   0x4   :  { %20 = vsyncpa [#allocation6], 0 }
   0x5   :  { %21 = vsyncpa [#allocation9], 0 }
   0x6   :  { %22 = vsyncpa [#allocation12], 0  ;;  %s4205_s23 = smov [#allocation5]   ;;  %s4065_s27 = scalar_lea.hbm %s4965_s3, 512 }
   0x7   :  { %s44_s24 = sshll.u32 %s4205_s23, 4  ;;  %p4066_p0 = scmp.ne.s32.totalorder %s4965_s3, %s4065_s27  ;;  %s45_s24 = int_to_ptr.vmem [resolvable:$true] %s44_s24 }
   0x8   :  { %p4069_p1 = scmp.lt.u32.totalorder %s4065_s27, %s4965_s3 }
   0xa   :  { %p4071_p2 = pnand %p4069_p1, %p4066_p0 }
   0xc   :  { %4074 = shalt.err (!%p4071_p2)
}
   0xd   :  { %s4075_s11 = scalar_lea.vmem %s45_s24, 512  ;;  %p4080_p4 = scmp.lt.s32.totalorder %s45_s24, %s45_s24 }
   0xe   :  { %p4076_p3 = scmp.ne.s32.totalorder %s45_s24, %s4075_s11  ;;  %p4081_p5 = scmp.lt.s32.totalorder %s4075_s11, %s4075_s11 }
  0x10   :  { %p4082_p6 = por %p4081_p5, %p4080_p4 }
  0x12   :  { %p4083_p7 = pnand %p4082_p6, %p4076_p3 }
  0x14   :  { %4086 = shalt.err (!%p4083_p7)
}
  0x15   :  { %s4206_s14 = smov 128   ;;  %s4207_s15 = smov 8  }
  0x16   :  { %50 = dma.hbm_to_vmem [thread:$0]  %s4965_s3, 512, %s45_s24, [#allocation6], %s4206_s14, %s4206_s14, %s4207_s15  }
  0x17   :  { %s4208_s18 = smov [#allocation8]   ;;  %s4209_s20 = smov [#allocation3]  }
  0x18   :  { %s70_s19 = sshll.u32 %s4208_s18, 4  ;;  %s30_s21 = sshll.u32 %s4209_s20, 4  ;;  %s71_s19 = int_to_ptr.vmem [resolvable:$true] %s70_s19  ;;  %s31_s21 = int_to_ptr.vmem [resolvable:$true] %s30_s21 }
  0x19   :  { %s4087_s25 = scalar_lea.hbm %s4968_s6, 1024 }
  0x1a   :  { %p4088_p8 = scmp.ne.s32.totalorder %s4968_s6, %s4087_s25  ;;  %p4091_p9 = scmp.lt.u32.totalorder %s4087_s25, %s4968_s6 }
  0x1c   :  { %p4093_p10 = pnand %p4091_p9, %p4088_p8 }
  0x1e   :  { %4096 = shalt.err (!%p4093_p10)
}
  0x1f   :  { %s4097_s3 = scalar_lea.vmem %s71_s19, 1024  ;;  %p4102_p12 = scmp.lt.s32.totalorder %s71_s19, %s71_s19 }
  0x20   :  { %p4098_p11 = scmp.ne.s32.totalorder %s71_s19, %s4097_s3  ;;  %p4103_p13 = scmp.lt.s32.totalorder %s4097_s3, %s4097_s3 }
  0x22   :  { %p4104_p0 = por %p4103_p13, %p4102_p12 }
  0x24   :  { %p4105_p1 = pnand %p4104_p0, %p4098_p11 }
  0x26   :  { %4108 = shalt.err (!%p4105_p1)
}
  0x27   :  { %s4210_s24 = smov 256   ;;  %s4211_s30 = smov 16  }
  0x28   :  { %76 = dma.hbm_to_vmem [thread:$0]  %s4968_s6, 1024, %s71_s19, [#allocation9], %s4210_s24, %s4210_s24, %s4211_s30  }
  0x29   :  { %s4109_s18 = scalar_lea.hbm %s4963_s1, 768 }
  0x2a   :  { %p4110_p2 = scmp.ne.s32.totalorder %s4963_s1, %s4109_s18  ;;  %p4113_p3 = scmp.lt.u32.totalorder %s4109_s18, %s4963_s1 }
  0x2c   :  { %p4115_p4 = pnand %p4113_p3, %p4110_p2 }
  0x2e   :  { %4118 = shalt.err (!%p4115_p4)
}
  0x2f   :  { %s4119_s26 = scalar_lea.vmem %s31_s21, 768  ;;  %p4124_p6 = scmp.lt.s32.totalorder %s31_s21, %s31_s21 }
  0x30   :  { %p4120_p5 = scmp.ne.s32.totalorder %s31_s21, %s4119_s26  ;;  %p4125_p7 = scmp.lt.s32.totalorder %s4119_s26, %s4119_s26 }
  0x32   :  { %p4126_p8 = por %p4125_p7, %p4124_p6 }
  0x34   :  { %p4127_p9 = pnand %p4126_p8, %p4120_p5 }
  0x36   :  { %4130 = shalt.err (!%p4127_p9)
}
  0x37   :  { %36 = dma.hbm_to_vmem [thread:$0]  %s4963_s1, 768, %s31_s21, [#allocation4], %s4210_s24, %s4210_s24, %s4211_s30  }
  0x38   :  { %s4212_s27 = smov [#allocation7]   ;;  %s4213_s29 = smov [#allocation10]  }
  0x39   :  { %s56_s28 = sshll.u32 %s4212_s27, 4  ;;  %s83_s3 = sshll.u32 %s4213_s29, 4  ;;  %s57_s28 = int_to_ptr.vmem [resolvable:$true] %s56_s28  ;;  %s84_s3 = int_to_ptr.vmem [resolvable:$true] %s83_s3 }
  0x3a   :  { %s4131_s16 = scalar_lea.hbm %s4966_s4, 512 }
  0x3b   :  { %p4132_p10 = scmp.ne.s32.totalorder %s4966_s4, %s4131_s16  ;;  %p4135_p11 = scmp.lt.u32.totalorder %s4131_s16, %s4966_s4 }
  0x3d   :  { %p4137_p12 = pnand %p4135_p11, %p4132_p10 }
  0x3f   :  { %4140 = shalt.err (!%p4137_p12)
}
  0x40   :  { %s4141_s1 = scalar_lea.vmem %s57_s28, 512  ;;  %p4146_p0 = scmp.lt.s32.totalorder %s57_s28, %s57_s28 }
  0x41   :  { %p4142_p13 = scmp.ne.s32.totalorder %s57_s28, %s4141_s1  ;;  %p4147_p1 = scmp.lt.s32.totalorder %s4141_s1, %s4141_s1 }
  0x43   :  { %p4148_p2 = por %p4147_p1, %p4146_p0 }
  0x45   :  { %p4149_p3 = pnand %p4148_p2, %p4142_p13 }
  0x47   :  { %4152 = shalt.err (!%p4149_p3)
}
  0x48   :  { %62 = dma.hbm_to_vmem [thread:$0]  %s4966_s4, 512, %s57_s28, [#allocation6], %s4206_s14, %s4206_s14, %s4207_s15  }
  0x49   :  { %s4153_s25 = scalar_lea.hbm %s4969_s7, 32 }
  0x4a   :  { %p4154_p4 = scmp.ne.s32.totalorder %s4969_s7, %s4153_s25  ;;  %p4157_p5 = scmp.lt.u32.totalorder %s4153_s25, %s4969_s7 }
  0x4c   :  { %p4159_p6 = pnand %p4157_p5, %p4154_p4 }
  0x4e   :  { %4162 = shalt.err (!%p4159_p6)
}
  0x4f   :  { %s4163_s29 = scalar_lea.vmem %s84_s3, 32  ;;  %p4168_p8 = scmp.lt.s32.totalorder %s84_s3, %s84_s3 }
  0x50   :  { %p4164_p7 = scmp.ne.s32.totalorder %s84_s3, %s4163_s29  ;;  %p4169_p9 = scmp.lt.s32.totalorder %s4163_s29, %s4163_s29 }
  0x52   :  { %p4170_p10 = por %p4169_p9, %p4168_p8 }
  0x54   :  { %p4171_p11 = pnand %p4170_p10, %p4164_p7 }
  0x56   :  { %4174 = shalt.err (!%p4171_p11)
}
  0x57   :  { %86 = dma.hbm_to_vmem [thread:$0]  %s4969_s7, 32, %s84_s3, [#allocation9]  }
  0x58   :  { %s4214_s13 = smov [#allocation11]   ;;  %s4175_s18 = scalar_lea.hbm %s4971_s9, 512 }
  0x59   :  { %s94_s11 = sshll.u32 %s4214_s13, 4  ;;  %p4176_p12 = scmp.ne.s32.totalorder %s4971_s9, %s4175_s18  ;;  %s95_s11 = int_to_ptr.vmem [resolvable:$true] %s94_s11 }
  0x5a   :  { %p4179_p13 = scmp.lt.u32.totalorder %s4175_s18, %s4971_s9 }
  0x5c   :  { %p4181_p0 = pnand %p4179_p13, %p4176_p12 }
  0x5e   :  { %4184 = shalt.err (!%p4181_p0)
}
  0x5f   :  { %s4185_s24 = scalar_lea.vmem %s95_s11, 512  ;;  %p4190_p2 = scmp.lt.s32.totalorder %s95_s11, %s95_s11 }
  0x60   :  { %p4186_p1 = scmp.ne.s32.totalorder %s95_s11, %s4185_s24  ;;  %p4191_p3 = scmp.lt.s32.totalorder %s4185_s24, %s4185_s24 }
  0x62   :  { %p4192_p4 = por %p4191_p3, %p4190_p2 }
  0x64   :  { %p4193_p5 = pnand %p4192_p4, %p4186_p1 }
  0x66   :  { %4196 = shalt.err (!%p4193_p5)
}
  0x67   :  { %100 = dma.hbm_to_vmem [thread:$0]  %s4971_s9, 512, %s95_s11, [#allocation12], %s4206_s14, %s4206_s14, %s4207_s15  }
  0x68   :  { %4197 = dma.done.wait [#allocation4], 768  }
  0x69   :  { %4198 = vsyncadd [#allocation4], 4294966528 }
  0x6a   :  { %4199 = dma.done.wait [#allocation6], 1024  }
  0x6b   :  { %4200 = vsyncadd [#allocation6], 4294966272 }
  0x6c   :  { %4201 = dma.done.wait [#allocation9], 1056  }
  0x6d   :  { %4202 = vsyncadd [#allocation9], 4294966240 }
  0x6e   :  { %4203 = dma.done.wait [#allocation12], 512  }
  0x6f   :  { %4204 = vsyncadd [#allocation12], 4294966784  ;;  %v4215_v1 = vmov 0   ;;  %v4216_v2 = vmov 0.0   ;;  %v130_v3 = vld [vmem:[%s4962_s0 + $0x28] sm:$0xff]  ;;  %v128_v4 = vld [vmem:[%s4962_s0 + $0x18] sm:$0xff]  ;;  %v123_v18 = vlaneseq }
  0x70   :  { %3860 = vset.pattern.permute.xlu1 %v4215_v1  ;;  %3859 = vset.pattern.permute.xlu0 %v4215_v1  ;;  %v131_v5 = vld [vmem:[%s4962_s0 + $0x30] sm:$0xff]  ;;  %v129_v6 = vld [vmem:[%s4962_s0 + $0x20] sm:$0xff]  ;;  %v186_v13 = vld [vmem:[#allocation3 + $0x28] sm:$0xf]  ;;  %vm224_vm0 = vcmask 1043456   ;;  %v4217_v17 = vmov 0.0|0.0  }
  0x71   :  { %313 = vmatprep.mubr.f32.mxu1 %v4216_v2  ;;  %295 = vmatprep.mubr.f32.mxu0 %v4216_v2  ;;  %v182_v7 = vld [vmem:[#allocation3 + $0x8] sm:$0xff]  ;;  %v184_v8 = vld [vmem:[#allocation3 + $0x18] sm:$0xff]  ;;  %v181_v9 = vld [vmem:[#allocation3] sm:$0xff]  ;;  %v4393_v19 = vand.u32 127, %v123_v18  ;;  %vm199_vm1 = vcmask 162816   ;;  %vm4218_vm8 = vmmov 0  }
  0x72   :  { %149 = vperm.xlu1 %3860, %v130_v3   ;;  %143 = vperm.xlu0 %3859, %v128_v4   ;;  %v3639_v10 = vpack.c.bf16 %v184_v8, %v182_v7  ;;  %v183_v11 = vld [vmem:[#allocation3 + $0x10] sm:$0xff]  ;;  %v125_v15 = vld [vmem:[%s4962_s0] sm:$0xff]  ;;  %v347_v26 = vld [vmem:[#allocation5 + $0x18] sm:$0xff]  ;;  %v4461_v50 = vshrl.u32 %v123_v18, 7  ;;  %s4220_s17 = smov 64   ;;  %vm352_vm10 = vcmask 261120  }
  0x73   :  { %v3641_v12 = vpack.c.bf16 %v183_v11, %v181_v9  ;;  %v132_v14 = vld [vmem:[%s4962_s0 + $0x38] sm:$0xff]  ;;  %v185_v16 = vld [vmem:[#allocation3 + $0x20] sm:$0xf]  ;;  %v351_v42 = vld [vmem:[#allocation7 + $0x18] sm:$0xff]  ;;  %vm3146_vm12 = vcmask 7168  }
  0x74   :  { %3809 = vmatprep.subr.bf16.mxu1 %v3639_v10  ;;  %3640 = vmatprep.subr.bf16.mxu0 %v3639_v10  ;;  %v344_v20 = vld [vmem:[#allocation5] sm:$0xff]  ;;  %v345_v21 = vld [vmem:[#allocation5 + $0x8] sm:$0xff]  ;;  %v346_v25 = vld [vmem:[#allocation5 + $0x10] sm:$0xff]  ;;  %v191_v54 = vsub.s32 0, %v4461_v50  ;;  %v195_v62 = vsub.s32 1, %v4461_v50 }
  0x75   :  { %3811 = vmatpush1.bf16.msra.mxu1 %v3641_v12  ;;  %3642 = vmatpush1.bf16.msra.mxu0 %v3641_v12  ;;  %v4395_v24 = vpack.c.bf16 %v345_v21, %v344_v20  ;;  %v4402_v30 = vpack.c.bf16 %v347_v26, %v346_v25  ;;  %v348_v37 = vld [vmem:[#allocation7] sm:$0xff]  ;;  %v349_v38 = vld [vmem:[#allocation7 + $0x8] sm:$0xff]  ;;  %v350_v41 = vld [vmem:[#allocation7 + $0x10] sm:$0xff] }
  0x76   :  { %152 = vperm.xlu1 %3860, %v131_v5   ;;  %146 = vperm.xlu0 %3859, %v129_v6   ;;  %v4432_v40 = vpack.c.bf16 %v349_v38, %v348_v37  ;;  %v4436_v43 = vpack.c.bf16 %v351_v42, %v350_v41  ;;  %v187_v56 = vld [vmem:[%s4964_s2] sm:$0x3]  ;;  %s4219_s2 = smov 32  }
  0x77   :  { %3810 = vmatprep.subr.msk.mxu1 %vm224_vm0, %v186_v13  ;;  %3164 = vmatprep.subr.msk.mxu0 %vm224_vm0, %v186_v13  ;;  %v4479_v58 = vrot.slane %v187_v56, %v191_v54  ;;  %v4485_v1 = vrot.slane %v187_v56, %v195_v62 }
  0x79   :  { %3812 = vmatpush1.msk.msra.mxu1 %vm224_vm0, %v185_v16  ;;  %3165 = vmatpush1.msk.msra.mxu0 %vm224_vm0, %v185_v16 }
  0x7a   :  { %155 = vperm.xlu0 %3859, %v132_v14   ;;  %134 = vperm.xlu1 %3860, %v125_v15  }
  0x7b   :  { %3643 = vmatprep.subr.bf16.mxu1 %v4217_v17  ;;  %3667 = vmatprep.subr.bf16.mxu0 %v4217_v17 }
  0xf1   :  { %v150_v22 = vpop.permute.xlu1 %149  ;;  %v144_v23 = vpop.permute.xlu0 %143 }
  0xf2   :  { %vm160_vm2 = vcmp.eq.s32.totalorder %v4393_v19, %v144_v23  ;;  %vm162_vm3 = vcmp.eq.s32.totalorder %v4393_v19, %v150_v22 }
  0xf3   :  { %v3159_v27 = vsel %vm160_vm2, 1.0, %v4216_v2  ;;  %v3161_v32 = vsel %vm162_vm3, 1.0, %v4216_v2 }
  0xf4   :  { %3169 = vmatmul.mubr.msk.f32.vlgmr.msra.gmra.mrb[0].mxu1 %vm199_vm1, %v3159_v27 }
  0xf5   :  { %3645 = vmatpush3.bf16.msra.mxu1 %v4395_v24  ;;  %v153_v28 = vpop.permute.xlu1 %152  ;;  %v147_v29 = vpop.permute.xlu0 %146  ;;  %319 = vmatprep.mubr.f32.mxu1 %v4216_v2 }
  0xf6   :  { %vm161_vm4 = vcmp.eq.s32.totalorder %v4393_v19, %v147_v29  ;;  %3646 = vmatprep.subr.bf16.mxu1 %v4217_v17  ;;  %vm163_vm6 = vcmp.eq.s32.totalorder %v4393_v19, %v153_v28 }
  0xf7   :  { %v3160_v31 = vsel %vm161_vm4, 1.0, %v4216_v2  ;;  %v3162_v36 = vsel %vm163_vm6, 1.0, %v4216_v2 }
  0xf8   :  { %3170 = vmatmul.mubr.msk.f32.gmra.mrb[2].mxu1 %vm199_vm1, %v3160_v31 }
  0xf9   :  { %v135_v33 = vpop.permute.xlu1 %134  ;;  %325 = vmatprep.mubr.f32.mxu1 %v4216_v2  ;;  %3648 = vmatpush3.bf16.msra.mxu1 %v4402_v30  ;;  %v156_v35 = vpop.permute.xlu0 %155 }
  0xfa   :  { %vm157_vm5 = vcmp.eq.s32.totalorder %v4393_v19, %v135_v33  ;;  %3649 = vmatprep.subr.bf16.mxu1 %v4217_v17  ;;  %vm164_vm7 = vcmp.eq.s32.totalorder %v4393_v19, %v156_v35 }
  0xfb   :  { %v3156_v34 = vsel %vm157_vm5, 1.0, %v4216_v2  ;;  %v3163_v39 = vsel %vm164_vm7, 1.0, %v4216_v2 }
  0xfc   :  { %3166 = vmatmul.mubr.msk.f32.vlgmr.msra.gmra.mrb[0].mxu0 %vm199_vm1, %v3156_v34  ;;  %3171 = vmatmul.mubr.msk.f32.gmra.mrb[4].mxu1 %vm199_vm1, %v3161_v32  ;;  %v126_v32 = vld [vmem:[%s4962_s0 + $0x8] sm:$0xff] }
  0xfd   :  { %331 = vmatprep.mubr.f32.mxu1 %v4216_v2  ;;  %301 = vmatprep.mubr.f32.mxu0 %v4216_v2 }
  0xfe   :  { %3669 = vmatpush3.bf16.msra.mxu0 %v4395_v24 }
  0xff   :  { %3670 = vmatprep.subr.bf16.mxu0 %v4217_v17 }
 0x100   :  { %3172 = vmatmul.mubr.msk.f32.gmra.mrb[6].mxu1 %vm199_vm1, %v3162_v36 }
 0x101   :  { %337 = vmatprep.mubr.f32.mxu1 %v4216_v2 }
 0x102   :  { %3672 = vmatpush3.bf16.msra.mxu0 %v4402_v30 }
 0x103   :  { %3679 = vmatprep.subr.bf16.mxu0 %v4217_v17 }
 0x104   :  { %3173 = vmatmul.mubr.msk.f32.gmra.mrb[8].mxu1 %vm199_vm1, %v3163_v39 }
 0x105   :  { %3372 = vmatprep.mubr.msk.f32.mxu1 %vm4218_vm8, %v4216_v2 }
 0x108   :  { %3373 = vmatmul.mubr.f32.vlgmr.msra.gmra.mrb[10].mxu1 %v4216_v2 }
 0x109   :  { %3651 = vmatpush3.bf16.msra.mxu1 %v4432_v40  ;;  %3383 = vmatprep.mubr.msk.f32.mxu1 %vm4218_vm8, %v4216_v2 }
 0x10a   :  { %3652 = vmatprep.subr.bf16.mxu1 %v4217_v17 }
 0x10d   :  { %3654 = vmatpush3.bf16.msra.mxu1 %v4436_v43 }
 0x10e   :  { %3655 = vmatprep.subr.bf16.mxu1 %v4217_v17 }
 0x110   :  { %3384 = vmatmul.mubr.f32.vlgmr.msra.gmra.mrb[12].mxu1 %v4216_v2 }
 0x111   :  { %3657 = vmatpush3.bf16.msra.mxu1 %v4395_v24  ;;  %3394 = vmatprep.mubr.msk.f32.mxu1 %vm4218_vm8, %v4216_v2 }
 0x112   :  { %3658 = vmatprep.subr.bf16.mxu1 %v4217_v17 }
 0x115   :  { %3660 = vmatpush3.bf16.msra.mxu1 %v4402_v30 }
 0x116   :  { %3661 = vmatprep.subr.bf16.mxu1 %v4217_v17 }
 0x1c7   :  { %v4450_v44 = vpop.f32.mrb[0].mxu1 }
 0x1c8   :  { %v4452_v45 = vpop.f32.mrb[1].mxu1 }
 0x1cb   :  { %v4454_v46 = vpop.f32.mrb[2].mxu1 }
 0x1cc   :  { %v4456_v47 = vpop.f32.mrb[3].mxu1 }
 0x1cf   :  { %v297_v48 = vpop.f32.mrb[0].mxu0  ;;  %v4458_v49 = vpop.f32.mrb[4].mxu1 }
 0x1d0   :  { %v4463_v51 = vpop.f32.mrb[1].mxu0  ;;  %v4465_v52 = vpop.f32.mrb[5].mxu1  ;;  %v298_v60 = vadd.f32 %v297_v48, %v4479_v58 }
 0x1d3   :  { %v4467_v53 = vpop.f32.mrb[6].mxu1 }
 0x1d4   :  { %v4470_v55 = vpop.f32.mrb[7].mxu1 }
 0x1d7   :  { %v4475_v57 = vpop.f32.mrb[8].mxu1 }
 0x1d8   :  { %v341_v59 = vpop.f32.mrb[9].mxu1 }
 0x1d9   :  { %v342_v3 = vadd.f32 %v341_v59, %v4485_v1 }
 0x1db   :  { %v422_v61 = vpop.f32.mrb[10].mxu1 }
 0x1dc   :  { %v426_v63 = vadd.f32 %v422_v61, %v298_v60  ;;  %v3374_v0 = vpop.f32.mrb[11].mxu1 }
 0x1dd   :  { %v336_v0 = vadd.f32 %v4470_v55, %v4485_v1 }
 0x1de   :  { %3861 = vtanh.f32 %v426_v63  ;;  %v3174_v9 = vmul.f32 -1.442695, %v426_v63 }
 0x1e3   :  { %v493_v4 = vpop.f32.mrb[12].mxu1 }
 0x1e4   :  { %v497_v5 = vadd.f32 %v493_v4, %v342_v3  ;;  %v3385_v6 = vpop.f32.mrb[13].mxu1 }
 0x1e6   :  { %3863 = vtanh.f32 %v497_v5  ;;  %v3175_v10 = vmul.f32 -1.442695, %v497_v5 }
 0x1e7   :  { %3865 = vpow2.f32 %v3174_v9 }
 0x1e8   :  { %v3862_v7 = vpop.eup %3861  ;;  %3867 = vpow2.f32 %v3175_v10 }
 0x1e9   :  { %507 = vrot.lane.b32.xlu0 %v3862_v7, %s4219_s2 }
 0x1f0   :  { %v3864_v8 = vpop.eup %3863 }
 0x1f1   :  { %531 = vrot.lane.b32.xlu1 %v3864_v8, %s4219_s2  ;;  %v3866_v11 = vpop.eup %3865 }
 0x1f2   :  { %v501_v12 = vadd.f32 1.0, %v3866_v11  ;;  %v3868_v13 = vpop.eup %3867 }
 0x1f3   :  { %v525_v14 = vadd.f32 1.0, %v3868_v13 }
 0x1f4   :  { %3869 = vrcp.f32 %v501_v12 }
 0x1f5   :  { %3871 = vrcp.f32 %v525_v14 }
 0x1fe   :  { %v3870_v15 = vpop.eup %3869 }
 0x1ff   :  { %v3872_v20 = vpop.eup %3871  ;;  %v505_v23 = vmul.f32 0.0, %v3870_v15 }
 0x200   :  { %v529_v27 = vmul.f32 0.0, %v3872_v20 }
 0x25b   :  { %v508_v16 = vpop.permute.xlu0 %507 }
 0x25c   :  { %v510_v18 = vmul.f32 %v3870_v15, %v508_v16 }
 0x25e   :  { %512 = vrot.lane.b32.xlu0 %v510_v18, %s4219_s2 }
 0x263   :  { %v532_v21 = vpop.permute.xlu1 %531 }
 0x264   :  { %v534_v22 = vmul.f32 %v3872_v20, %v532_v21 }
 0x266   :  { %536 = vrot.lane.b32.xlu1 %v534_v22, %s4219_s2 }
 0x2d0   :  { %v513_v25 = vpop.permute.xlu0 %512 }
 0x2d1   :  { %v4492_v26 = vadd.f32 %v513_v25, %v505_v23 }
 0x2d3   :  { %3873 = vtanh.f32 %v4492_v26 }
 0x2d8   :  { %v537_v28 = vpop.permute.xlu1 %536 }
 0x2d9   :  { %v4495_v29 = vadd.f32 %v537_v28, %v529_v27 }
 0x2db   :  { %3875 = vtanh.f32 %v4495_v29 }
 0x2dd   :  { %v3874_v31 = vpop.eup %3873 }
 0x2de   :  { %518 = vrot.lane.b32.xlu0 %v3874_v31, %s4219_s2 }
 0x2e2   :  { %137 = vperm.xlu0 %3859, %v126_v32   ;;  %v127_v32 = vld [vmem:[%s4962_s0 + $0x10] sm:$0xff] }
 0x2e5   :  { %v3876_v33 = vpop.eup %3875 }
 0x2e6   :  { %542 = vrot.lane.b32.xlu1 %v3876_v33, %s4219_s2 }
 0x350   :  { %v519_v34 = vpop.permute.xlu0 %518 }
 0x351   :  { %v521_v35 = vmul.f32 %v3870_v15, %v519_v34 }
 0x353   :  { %547 = vrot.lane.b32.xlu1 %v521_v35, %s4220_s17 }
 0x358   :  { %v543_v36 = vpop.permute.xlu1 %542 }
 0x359   :  { %v545_v37 = vmul.f32 %v3872_v20, %v543_v36 }
 0x35b   :  { %623 = vrot.lane.b32.xlu0 %v545_v37, %s4220_s17 }
 0x361   :  { %v138_v38 = vpop.permute.xlu0 %137 }
 0x362   :  { %vm158_vm9 = vcmp.eq.s32.totalorder %v4393_v19, %v138_v38 }
 0x363   :  { %v3157_v39 = vsel %vm158_vm9, 1.0, %v4216_v2 }
 0x364   :  { %3167 = vmatmul.mubr.msk.f32.gmra.mrb[2].mxu0 %vm199_vm1, %v3157_v39 }
 0x365   :  { %307 = vmatprep.mubr.f32.mxu0 %v4216_v2 }
 0x3c5   :  { %v4509_v41 = vpop.permute.xlu1 %547 }
 0x3c6   :  { %3395 = vmatmul.mubr.msk.f32.vlgmr.msra.gmra.mrb[14].mxu1 %vm352_vm10, %v4509_v41 }
 0x3c7   :  { %3663 = vmatpush3.bf16.msra.mxu1 %v4432_v40  ;;  %3405 = vmatprep.mubr.msk.f32.mxu1 %vm4218_vm8, %v4216_v2 }
 0x3c8   :  { %3664 = vmatprep.subr.bf16.mxu1 %v4217_v17 }
 0x3cb   :  { %3666 = vmatpush3.bf16.msra.mxu1 %v4436_v43 }
 0x3cc   :  { %3673 = vmatprep.subr.bf16.mxu1 %v4217_v17 }
 0x3cd   :  { %v4519_v42 = vpop.permute.xlu0 %623 }
 0x3ce   :  { %3406 = vmatmul.mubr.msk.f32.vlgmr.msra.gmra.mrb[16].mxu1 %vm352_vm10, %v4519_v42 }
 0x3cf   :  { %3675 = vmatpush3.bf16.msra.mxu1 %v4432_v40  ;;  %3427 = vmatprep.mubr.msk.f32.mxu1 %vm4218_vm8, %v4216_v2 }
 0x3d0   :  { %3676 = vmatprep.subr.bf16.mxu1 %v4217_v17 }
 0x3d3   :  { %3678 = vmatpush3.bf16.msra.mxu1 %v4436_v43 }
 0x3d4   :  { %3685 = vmatprep.subr.bf16.mxu1 %v4217_v17 }
 0x437   :  { %v303_v48 = vpop.f32.mrb[2].mxu0 }
 0x438   :  { %v4529_v56 = vpop.f32.mrb[3].mxu0  ;;  %v304_v59 = vadd.f32 %v303_v48, %v4479_v58 }
 0x499   :  { %v617_v60 = vpop.f32.mrb[14].mxu1 }
 0x49a   :  { %v621_v61 = vadd.f32 %v617_v60, %v304_v59  ;;  %v3396_v63 = vpop.f32.mrb[15].mxu1 }
 0x49c   :  { %3877 = vtanh.f32 %v621_v61  ;;  %v3178_v8 = vmul.f32 -1.442695, %v621_v61 }
 0x4a1   :  { %v693_v3 = vpop.f32.mrb[16].mxu1 }
 0x4a2   :  { %v697_v4 = vadd.f32 %v693_v3, %v336_v0  ;;  %v3407_v5 = vpop.f32.mrb[17].mxu1  ;;  %v330_v0 = vadd.f32 %v4465_v52, %v4485_v1 }
 0x4a4   :  { %3879 = vtanh.f32 %v697_v4  ;;  %v3179_v9 = vmul.f32 -1.442695, %v697_v4 }
 0x4a5   :  { %3881 = vpow2.f32 %v3178_v8 }
 0x4a6   :  { %v3878_v6 = vpop.eup %3877  ;;  %3883 = vpow2.f32 %v3179_v9 }
 0x4a7   :  { %707 = vrot.lane.b32.xlu1 %v3878_v6, %s4219_s2 }
 0x4ae   :  { %v3880_v7 = vpop.eup %3879 }
 0x4af   :  { %731 = vrot.lane.b32.xlu0 %v3880_v7, %s4219_s2  ;;  %v3882_v10 = vpop.eup %3881 }
 0x4b0   :  { %v701_v11 = vadd.f32 1.0, %v3882_v10  ;;  %v3884_v12 = vpop.eup %3883 }
 0x4b1   :  { %v725_v13 = vadd.f32 1.0, %v3884_v12 }
 0x4b2   :  { %3885 = vrcp.f32 %v701_v11 }
 0x4b3   :  { %3887 = vrcp.f32 %v725_v13 }
 0x4bc   :  { %v3886_v55 = vpop.eup %3885 }
 0x4bd   :  { %v3888_v16 = vpop.eup %3887  ;;  %v705_v21 = vmul.f32 %v3886_v55, %v4492_v26 }
 0x4be   :  { %v729_v25 = vmul.f32 %v3888_v16, %v4495_v29 }
 0x519   :  { %v708_v14 = vpop.permute.xlu1 %707 }
 0x51a   :  { %v710_v15 = vmul.f32 %v3886_v55, %v708_v14 }
 0x51c   :  { %712 = vrot.lane.b32.xlu1 %v710_v15, %s4219_s2 }
 0x521   :  { %v732_v18 = vpop.permute.xlu0 %731 }
 0x522   :  { %v734_v20 = vmul.f32 %v3888_v16, %v732_v18 }
 0x524   :  { %736 = vrot.lane.b32.xlu0 %v734_v20, %s4219_s2 }
 0x58e   :  { %v713_v22 = vpop.permute.xlu1 %712 }
 0x58f   :  { %v4539_v23 = vadd.f32 %v713_v22, %v705_v21 }
 0x591   :  { %3889 = vtanh.f32 %v4539_v23 }
 0x596   :  { %v737_v27 = vpop.permute.xlu0 %736 }
 0x597   :  { %v4543_v28 = vadd.f32 %v737_v27, %v729_v25 }
 0x599   :  { %3891 = vtanh.f32 %v4543_v28 }
 0x59b   :  { %v3890_v31 = vpop.eup %3889 }
 0x59c   :  { %718 = vrot.lane.b32.xlu1 %v3890_v31, %s4219_s2 }
 0x5a0   :  { %140 = vperm.xlu1 %3860, %v127_v32  }
 0x5a3   :  { %v3892_v26 = vpop.eup %3891 }
 0x5a4   :  { %742 = vrot.lane.b32.xlu0 %v3892_v26, %s4219_s2 }
 0x60e   :  { %v719_v33 = vpop.permute.xlu1 %718 }
 0x60f   :  { %v721_v34 = vmul.f32 %v3886_v55, %v719_v33 }
 0x611   :  { %747 = vrot.lane.b32.xlu0 %v721_v34, %s4220_s17 }
 0x616   :  { %v743_v29 = vpop.permute.xlu0 %742 }
 0x617   :  { %v745_v35 = vmul.f32 %v3888_v16, %v743_v29 }
 0x619   :  { %823 = vrot.lane.b32.xlu1 %v745_v35, %s4220_s17 }
 0x61f   :  { %v141_v36 = vpop.permute.xlu1 %140 }
 0x620   :  { %vm159_vm11 = vcmp.eq.s32.totalorder %v4393_v19, %v141_v36  ;;  %v316_v36 = vadd.f32 %v4450_v44, %v4479_v58 }
 0x621   :  { %v3158_v37 = vsel %vm159_vm11, 1.0, %v4216_v2 }
 0x622   :  { %3168 = vmatmul.mubr.msk.f32.gmra.mrb[4].mxu0 %vm199_vm1, %v3158_v37 }
 0x623   :  { %3416 = vmatprep.mubr.msk.f32.mxu0 %vm4218_vm8, %v4216_v2 }
 0x683   :  { %v4558_v38 = vpop.permute.xlu0 %747 }
 0x684   :  { %3417 = vmatmul.mubr.msk.f32.vlgmr.msra.gmra.mrb[6].mxu0 %vm352_vm10, %v4558_v38 }
 0x685   :  { %3681 = vmatpush3.bf16.msra.mxu0 %v4395_v24  ;;  %3438 = vmatprep.mubr.msk.f32.mxu0 %vm4218_vm8, %v4216_v2 }
 0x686   :  { %3682 = vmatprep.subr.bf16.mxu0 %v4217_v17 }
 0x689   :  { %3684 = vmatpush3.bf16.msra.mxu0 %v4402_v30 }
 0x68a   :  { %3691 = vmatprep.subr.bf16.mxu0 %v4217_v17 }
 0x68b   :  { %v4568_v19 = vpop.permute.xlu1 %823 }
 0x68c   :  { %3428 = vmatmul.mubr.msk.f32.vlgmr.msra.gmra.mrb[18].mxu1 %vm352_vm10, %v4568_v19 }
 0x68d   :  { %3687 = vmatpush3.bf16.msra.mxu1 %v4432_v40  ;;  %3449 = vmatprep.mubr.msk.f32.mxu1 %vm4218_vm8, %v4216_v2 }
 0x68e   :  { %3688 = vmatprep.subr.bf16.mxu1 %v4217_v17 }
 0x691   :  { %3690 = vmatpush3.bf16.msra.mxu1 %v4436_v43 }
 0x692   :  { %3697 = vmatprep.subr.bf16.mxu1 %v4217_v17 }
 0x6f5   :  { %v309_v39 = vpop.f32.mrb[4].mxu0 }
 0x6f6   :  { %v4578_v48 = vpop.f32.mrb[5].mxu0  ;;  %v310_v59 = vadd.f32 %v309_v39, %v4479_v58 }
 0x757   :  { %v817_v60 = vpop.f32.mrb[6].mxu0 }
 0x758   :  { %v821_v61 = vadd.f32 %v817_v60, %v310_v59  ;;  %v3418_v63 = vpop.f32.mrb[7].mxu0  ;;  %v324_v60 = vadd.f32 %v4456_v47, %v4485_v1 }
 0x75a   :  { %3893 = vtanh.f32 %v821_v61  ;;  %v3182_v8 = vmul.f32 -1.442695, %v821_v61 }
 0x75f   :  { %v893_v3 = vpop.f32.mrb[18].mxu1 }
 0x760   :  { %v897_v4 = vadd.f32 %v893_v3, %v330_v0  ;;  %v3429_v5 = vpop.f32.mrb[19].mxu1 }
 0x762   :  { %3895 = vtanh.f32 %v897_v4  ;;  %v3183_v9 = vmul.f32 -1.442695, %v897_v4 }
 0x763   :  { %3897 = vpow2.f32 %v3182_v8 }
 0x764   :  { %v3894_v6 = vpop.eup %3893  ;;  %3899 = vpow2.f32 %v3183_v9 }
 0x765   :  { %907 = vrot.lane.b32.xlu0 %v3894_v6, %s4219_s2 }
 0x76c   :  { %v3896_v7 = vpop.eup %3895 }
 0x76d   :  { %931 = vrot.lane.b32.xlu1 %v3896_v7, %s4219_s2  ;;  %v3898_v10 = vpop.eup %3897 }
 0x76e   :  { %v901_v11 = vadd.f32 1.0, %v3898_v10  ;;  %v3900_v12 = vpop.eup %3899 }
 0x76f   :  { %v925_v13 = vadd.f32 1.0, %v3900_v12 }
 0x770   :  { %3901 = vrcp.f32 %v901_v11 }
 0x771   :  { %3903 = vrcp.f32 %v925_v13 }
 0x77a   :  { %v3902_v52 = vpop.eup %3901 }
 0x77b   :  { %v3904_v15 = vpop.eup %3903  ;;  %v905_v20 = vmul.f32 %v3902_v52, %v4539_v23 }
 0x77c   :  { %v929_v25 = vmul.f32 %v3904_v15, %v4543_v28 }
 0x7d7   :  { %v908_v55 = vpop.permute.xlu0 %907 }
 0x7d8   :  { %v910_v14 = vmul.f32 %v3902_v52, %v908_v55 }
 0x7da   :  { %912 = vrot.lane.b32.xlu0 %v910_v14, %s4219_s2 }
 0x7df   :  { %v932_v16 = vpop.permute.xlu1 %931 }
 0x7e0   :  { %v934_v18 = vmul.f32 %v3904_v15, %v932_v16 }
 0x7e2   :  { %936 = vrot.lane.b32.xlu1 %v934_v18, %s4219_s2 }
 0x84c   :  { %v913_v21 = vpop.permute.xlu0 %912 }
 0x84d   :  { %v915_v22 = vadd.f32 %v913_v21, %v905_v20 }
 0x84f   :  { %3905 = vtanh.f32 %v915_v22 }
 0x854   :  { %v937_v27 = vpop.permute.xlu1 %936 }
 0x855   :  { %v939_v31 = vadd.f32 %v937_v27, %v929_v25 }
 0x857   :  { %3907 = vtanh.f32 %v939_v31 }
 0x859   :  { %v3906_v32 = vpop.eup %3905 }
 0x85a   :  { %918 = vrot.lane.b32.xlu0 %v3906_v32, %s4219_s2 }
 0x861   :  { %v3908_v26 = vpop.eup %3907 }
 0x862   :  { %942 = vrot.lane.b32.xlu1 %v3908_v26, %s4219_s2 }
 0x8cc   :  { %v919_v33 = vpop.permute.xlu0 %918 }
 0x8cd   :  { %v921_v34 = vmul.f32 %v3902_v52, %v919_v33 }
 0x8cf   :  { %947 = vrot.lane.b32.xlu0 %v921_v34, %s4220_s17  ;;  %v322_v34 = vadd.f32 %v4454_v46, %v4479_v58 }
 0x8d4   :  { %v943_v29 = vpop.permute.xlu1 %942 }
 0x8d5   :  { %v945_v23 = vmul.f32 %v3904_v15, %v943_v29 }
 0x8d7   :  { %1023 = vrot.lane.b32.xlu1 %v945_v23, %s4220_s17 }
 0x941   :  { %v4593_v35 = vpop.permute.xlu0 %947 }
 0x942   :  { %3439 = vmatmul.mubr.msk.f32.vlgmr.msra.gmra.mrb[8].mxu0 %vm352_vm10, %v4593_v35 }
 0x943   :  { %3693 = vmatpush3.bf16.msra.mxu0 %v4395_v24  ;;  %3460 = vmatprep.mubr.msk.f32.mxu0 %vm4218_vm8, %v4216_v2 }
 0x944   :  { %3694 = vmatprep.subr.bf16.mxu0 %v4217_v17 }
 0x947   :  { %3696 = vmatpush3.bf16.msra.mxu0 %v4402_v30 }
 0x948   :  { %3703 = vmatprep.subr.bf16.mxu0 %v4217_v17 }
 0x949   :  { %v4603_v28 = vpop.permute.xlu1 %1023 }
 0x94a   :  { %3450 = vmatmul.mubr.msk.f32.vlgmr.msra.gmra.mrb[20].mxu1 %vm352_vm10, %v4603_v28 }
 0x94b   :  { %3699 = vmatpush3.bf16.msra.mxu1 %v4432_v40  ;;  %3471 = vmatprep.mubr.msk.f32.mxu1 %vm4218_vm8, %v4216_v2 }
 0x94c   :  { %3700 = vmatprep.subr.bf16.mxu1 %v4217_v17 }
 0x94f   :  { %3702 = vmatpush3.bf16.msra.mxu1 %v4436_v43 }
 0x950   :  { %3709 = vmatprep.subr.bf16.mxu1 %v4217_v17 }
 0xa15   :  { %v1017_v37 = vpop.f32.mrb[8].mxu0 }
 0xa16   :  { %v1021_v39 = vadd.f32 %v1017_v37, %v316_v36  ;;  %v3440_v59 = vpop.f32.mrb[9].mxu0  ;;  %v318_v37 = vadd.f32 %v4452_v45, %v4485_v1 }
 0xa18   :  { %3909 = vtanh.f32 %v1021_v39  ;;  %v3186_v5 = vmul.f32 -1.442695, %v1021_v39 }
 0xa1d   :  { %v1093_v61 = vpop.f32.mrb[20].mxu1 }
 0xa1e   :  { %v1097_v63 = vadd.f32 %v1093_v61, %v324_v60  ;;  %v3451_v0 = vpop.f32.mrb[21].mxu1 }
 0xa20   :  { %3911 = vtanh.f32 %v1097_v63  ;;  %v3187_v44 = vmul.f32 -1.442695, %v1097_v63 }
 0xa21   :  { %3913 = vpow2.f32 %v3186_v5 }
 0xa22   :  { %v3910_v3 = vpop.eup %3909  ;;  %3915 = vpow2.f32 %v3187_v44 }
 0xa23   :  { %1107 = vrot.lane.b32.xlu0 %v3910_v3, %s4219_s2 }
 0xa2a   :  { %v3912_v4 = vpop.eup %3911 }
 0xa2b   :  { %1131 = vrot.lane.b32.xlu1 %v3912_v4, %s4219_s2  ;;  %v3914_v6 = vpop.eup %3913 }
 0xa2c   :  { %v1101_v7 = vadd.f32 1.0, %v3914_v6  ;;  %v3916_v8 = vpop.eup %3915 }
 0xa2d   :  { %v1125_v9 = vadd.f32 1.0, %v3916_v8 }
 0xa2e   :  { %3917 = vrcp.f32 %v1101_v7 }
 0xa2f   :  { %3919 = vrcp.f32 %v1125_v9 }
 0xa38   :  { %v3918_v47 = vpop.eup %3917 }
 0xa39   :  { %v3920_v12 = vpop.eup %3919  ;;  %v1105_v55 = vmul.f32 %v3918_v47, %v915_v22 }
 0xa3a   :  { %v1129_v16 = vmul.f32 %v3920_v12, %v939_v31 }
 0xa95   :  { %v1108_v10 = vpop.permute.xlu0 %1107 }
 0xa96   :  { %v1110_v11 = vmul.f32 %v3918_v47, %v1108_v10 }
 0xa98   :  { %1112 = vrot.lane.b32.xlu0 %v1110_v11, %s4219_s2 }
 0xa9d   :  { %v1132_v13 = vpop.permute.xlu1 %1131 }
 0xa9e   :  { %v1134_v52 = vmul.f32 %v3920_v12, %v1132_v13 }
 0xaa0   :  { %1136 = vrot.lane.b32.xlu1 %v1134_v52, %s4219_s2 }
 0xb0a   :  { %v1113_v14 = vpop.permute.xlu0 %1112 }
 0xb0b   :  { %v1115_v15 = vadd.f32 %v1113_v14, %v1105_v55 }
 0xb0d   :  { %3921 = vtanh.f32 %v1115_v15 }
 0xb12   :  { %v1137_v18 = vpop.permute.xlu1 %1136 }
 0xb13   :  { %v1139_v20 = vadd.f32 %v1137_v18, %v1129_v16 }
 0xb15   :  { %3923 = vtanh.f32 %v1139_v20 }
 0xb17   :  { %v3922_v21 = vpop.eup %3921 }
 0xb18   :  { %1118 = vrot.lane.b32.xlu0 %v3922_v21, %s4219_s2 }
 0xb1f   :  { %v3924_v25 = vpop.eup %3923 }
 0xb20   :  { %1142 = vrot.lane.b32.xlu1 %v3924_v25, %s4219_s2 }
 0xb8a   :  { %v1119_v27 = vpop.permute.xlu0 %1118 }
 0xb8b   :  { %v1121_v32 = vmul.f32 %v3918_v47, %v1119_v27 }
 0xb8d   :  { %1147 = vrot.lane.b32.xlu0 %v1121_v32, %s4220_s17  ;;  %v328_v32 = vadd.f32 %v4458_v49, %v4479_v58 }
 0xb92   :  { %v1143_v26 = vpop.permute.xlu1 %1142 }
 0xb93   :  { %v1145_v33 = vmul.f32 %v3920_v12, %v1143_v26 }
 0xb95   :  { %1223 = vrot.lane.b32.xlu1 %v1145_v33, %s4220_s17 }
 0xbff   :  { %v4625_v22 = vpop.permute.xlu0 %1147 }
 0xc00   :  { %3461 = vmatmul.mubr.msk.f32.vlgmr.msra.gmra.mrb[10].mxu0 %vm352_vm10, %v4625_v22 }
 0xc01   :  { %3705 = vmatpush3.bf16.msra.mxu0 %v4395_v24  ;;  %3482 = vmatprep.mubr.msk.f32.mxu0 %vm4218_vm8, %v4216_v2 }
 0xc02   :  { %3706 = vmatprep.subr.bf16.mxu0 %v4217_v17 }
 0xc05   :  { %3708 = vmatpush3.bf16.msra.mxu0 %v4402_v30 }
 0xc06   :  { %3715 = vmatprep.subr.bf16.mxu0 %v4217_v17 }
 0xc07   :  { %v4635_v31 = vpop.permute.xlu1 %1223 }
 0xc08   :  { %3472 = vmatmul.mubr.msk.f32.vlgmr.msra.gmra.mrb[22].mxu1 %vm352_vm10, %v4635_v31 }
 0xc09   :  { %3711 = vmatpush3.bf16.msra.mxu1 %v4432_v40  ;;  %3493 = vmatprep.mubr.msk.f32.mxu1 %vm4218_vm8, %v4216_v2 }
 0xc0a   :  { %3712 = vmatprep.subr.bf16.mxu1 %v4217_v17 }
 0xc0d   :  { %3714 = vmatpush3.bf16.msra.mxu1 %v4436_v43 }
 0xc0e   :  { %3721 = vmatprep.subr.bf16.mxu1 %v4217_v17 }
 0xcd3   :  { %v1217_v29 = vpop.f32.mrb[10].mxu0 }
 0xcd4   :  { %v1221_v23 = vadd.f32 %v1217_v29, %v322_v34  ;;  %v3462_v36 = vpop.f32.mrb[11].mxu0  ;;  %v312_v29 = vadd.f32 %v4578_v48, %v4485_v1 }
 0xcd6   :  { %3925 = vtanh.f32 %v1221_v23  ;;  %v3190_v0 = vmul.f32 -1.442695, %v1221_v23 }
 0xcdb   :  { %v1293_v39 = vpop.f32.mrb[22].mxu1 }
 0xcdc   :  { %v1297_v59 = vadd.f32 %v1293_v39, %v318_v37  ;;  %v3473_v60 = vpop.f32.mrb[23].mxu1 }
 0xcde   :  { %3927 = vtanh.f32 %v1297_v59  ;;  %v3191_v46 = vmul.f32 -1.442695, %v1297_v59 }
 0xcdf   :  { %3929 = vpow2.f32 %v3190_v0 }
 0xce0   :  { %v3926_v61 = vpop.eup %3925  ;;  %3931 = vpow2.f32 %v3191_v46 }
 0xce1   :  { %1307 = vrot.lane.b32.xlu0 %v3926_v61, %s4219_s2 }
 0xce8   :  { %v3928_v63 = vpop.eup %3927 }
 0xce9   :  { %1331 = vrot.lane.b32.xlu1 %v3928_v63, %s4219_s2  ;;  %v3930_v3 = vpop.eup %3929 }
 0xcea   :  { %v1301_v4 = vadd.f32 1.0, %v3930_v3  ;;  %v3932_v5 = vpop.eup %3931 }
 0xceb   :  { %v1325_v44 = vadd.f32 1.0, %v3932_v5 }
 0xcec   :  { %3933 = vrcp.f32 %v1301_v4 }
 0xced   :  { %3935 = vrcp.f32 %v1325_v44 }
 0xcf6   :  { %v3934_v45 = vpop.eup %3933 }
 0xcf7   :  { %v3936_v8 = vpop.eup %3935  ;;  %v1305_v10 = vmul.f32 %v3934_v45, %v1115_v15 }
 0xcf8   :  { %v1329_v13 = vmul.f32 %v3936_v8, %v1139_v20 }
 0xd53   :  { %v1308_v6 = vpop.permute.xlu0 %1307 }
 0xd54   :  { %v1310_v7 = vmul.f32 %v3934_v45, %v1308_v6 }
 0xd56   :  { %1312 = vrot.lane.b32.xlu0 %v1310_v7, %s4219_s2 }
 0xd5b   :  { %v1332_v9 = vpop.permute.xlu1 %1331 }
 0xd5c   :  { %v1334_v47 = vmul.f32 %v3936_v8, %v1332_v9 }
 0xd5e   :  { %1336 = vrot.lane.b32.xlu1 %v1334_v47, %s4219_s2 }
 0xdc8   :  { %v1313_v11 = vpop.permute.xlu0 %1312 }
 0xdc9   :  { %v1315_v12 = vadd.f32 %v1313_v11, %v1305_v10 }
 0xdcb   :  { %3937 = vtanh.f32 %v1315_v12 }
 0xdd0   :  { %v1337_v52 = vpop.permute.xlu1 %1336 }
 0xdd1   :  { %v1339_v55 = vadd.f32 %v1337_v52, %v1329_v13 }
 0xdd3   :  { %3939 = vtanh.f32 %v1339_v55 }
 0xdd5   :  { %v3938_v14 = vpop.eup %3937 }
 0xdd6   :  { %1318 = vrot.lane.b32.xlu0 %v3938_v14, %s4219_s2 }
 0xddd   :  { %v3940_v16 = vpop.eup %3939 }
 0xdde   :  { %1342 = vrot.lane.b32.xlu1 %v3940_v16, %s4219_s2 }
 0xe48   :  { %v1319_v18 = vpop.permute.xlu0 %1318 }
 0xe49   :  { %v1321_v21 = vmul.f32 %v3934_v45, %v1319_v18 }
 0xe4b   :  { %1347 = vrot.lane.b32.xlu0 %v1321_v21, %s4220_s17 }
 0xe50   :  { %v1343_v25 = vpop.permute.xlu1 %1342 }
 0xe51   :  { %v1345_v27 = vmul.f32 %v3936_v8, %v1343_v25 }
 0xe53   :  { %1423 = vrot.lane.b32.xlu1 %v1345_v27, %s4220_s17  ;;  %v306_v27 = vadd.f32 %v4529_v56, %v4485_v1 }
 0xebd   :  { %v4657_v15 = vpop.permute.xlu0 %1347 }
 0xebe   :  { %3483 = vmatmul.mubr.msk.f32.vlgmr.msra.gmra.mrb[12].mxu0 %vm352_vm10, %v4657_v15 }
 0xebf   :  { %3717 = vmatpush3.bf16.msra.mxu0 %v4395_v24  ;;  %3504 = vmatprep.mubr.msk.f32.mxu0 %vm4218_vm8, %v4216_v2 }
 0xec0   :  { %3718 = vmatprep.subr.bf16.mxu0 %v4217_v17 }
 0xec3   :  { %3720 = vmatpush3.bf16.msra.mxu0 %v4402_v30 }
 0xec4   :  { %3727 = vmatprep.subr.bf16.mxu0 %v4217_v17 }
 0xec5   :  { %v4667_v20 = vpop.permute.xlu1 %1423 }
 0xec6   :  { %3494 = vmatmul.mubr.msk.f32.vlgmr.msra.gmra.mrb[24].mxu1 %vm352_vm10, %v4667_v20 }
 0xec7   :  { %3723 = vmatpush3.bf16.msra.mxu1 %v4432_v40  ;;  %3515 = vmatprep.mubr.msk.f32.mxu1 %vm4218_vm8, %v4216_v2 }
 0xec8   :  { %3724 = vmatprep.subr.bf16.mxu1 %v4217_v17 }
 0xecb   :  { %3726 = vmatpush3.bf16.msra.mxu1 %v4436_v43 }
 0xecc   :  { %3733 = vmatprep.subr.bf16.mxu1 %v4217_v17 }
 0xf91   :  { %v1417_v26 = vpop.f32.mrb[12].mxu0 }
 0xf92   :  { %v1421_v33 = vadd.f32 %v1417_v26, %v328_v32  ;;  %v3484_v34 = vpop.f32.mrb[13].mxu0 }
 0xf94   :  { %3941 = vtanh.f32 %v1421_v33  ;;  %v3194_v60 = vmul.f32 -1.442695, %v1421_v33 }
 0xf99   :  { %v1493_v23 = vpop.f32.mrb[24].mxu1 }
 0xf9a   :  { %v1497_v36 = vadd.f32 %v1493_v23, %v312_v29  ;;  %v3495_v37 = vpop.f32.mrb[25].mxu1 }
 0xf9c   :  { %3943 = vtanh.f32 %v1497_v36  ;;  %v3195_v49 = vmul.f32 -1.442695, %v1497_v36 }
 0xf9d   :  { %3945 = vpow2.f32 %v3194_v60 }
 0xf9e   :  { %v3942_v39 = vpop.eup %3941  ;;  %3947 = vpow2.f32 %v3195_v49 }
 0xf9f   :  { %1507 = vrot.lane.b32.xlu0 %v3942_v39, %s4219_s2 }
 0xfa6   :  { %v3944_v59 = vpop.eup %3943 }
 0xfa7   :  { %1531 = vrot.lane.b32.xlu1 %v3944_v59, %s4219_s2  ;;  %v3946_v61 = vpop.eup %3945 }
 0xfa8   :  { %v1501_v63 = vadd.f32 1.0, %v3946_v61  ;;  %v3948_v0 = vpop.eup %3947 }
 0xfa9   :  { %v1525_v46 = vadd.f32 1.0, %v3948_v0 }
 0xfaa   :  { %3949 = vrcp.f32 %v1501_v63 }
 0xfab   :  { %3951 = vrcp.f32 %v1525_v46 }
 0xfb4   :  { %v3950_v48 = vpop.eup %3949 }
 0xfb5   :  { %v3952_v5 = vpop.eup %3951  ;;  %v1505_v6 = vmul.f32 %v3950_v48, %v1315_v12 }
 0xfb6   :  { %v1529_v9 = vmul.f32 %v3952_v5, %v1339_v55 }
0x1011   :  { %v1508_v3 = vpop.permute.xlu0 %1507 }
0x1012   :  { %v1510_v4 = vmul.f32 %v3950_v48, %v1508_v3 }
0x1014   :  { %1512 = vrot.lane.b32.xlu0 %v1510_v4, %s4219_s2 }
0x1019   :  { %v1532_v44 = vpop.permute.xlu1 %1531 }
0x101a   :  { %v1534_v45 = vmul.f32 %v3952_v5, %v1532_v44  ;;  %v1949_v44 = vld [vmem:[%s4967_s5 + $0x18] sm:$0xff] }
0x101c   :  { %1536 = vrot.lane.b32.xlu1 %v1534_v45, %s4219_s2 }
0x1086   :  { %v1513_v7 = vpop.permute.xlu0 %1512 }
0x1087   :  { %v1515_v8 = vadd.f32 %v1513_v7, %v1505_v6 }
0x1089   :  { %3953 = vtanh.f32 %v1515_v8 }
0x108e   :  { %v1537_v47 = vpop.permute.xlu1 %1536 }
0x108f   :  { %v1539_v10 = vadd.f32 %v1537_v47, %v1529_v9 }
0x1091   :  { %3955 = vtanh.f32 %v1539_v10 }
0x1093   :  { %v3954_v11 = vpop.eup %3953 }
0x1094   :  { %1518 = vrot.lane.b32.xlu0 %v3954_v11, %s4219_s2  ;;  %v1946_v11 = vld [vmem:[%s4967_s5] sm:$0xff] }
0x109b   :  { %v3956_v13 = vpop.eup %3955 }
0x109c   :  { %1542 = vrot.lane.b32.xlu1 %v3956_v13, %s4219_s2  ;;  %v1948_v13 = vld [vmem:[%s4967_s5 + $0x10] sm:$0xff] }
0x1106   :  { %v1519_v52 = vpop.permute.xlu0 %1518 }
0x1107   :  { %v1521_v14 = vmul.f32 %v3950_v48, %v1519_v52  ;;  %v1951_v52 = vld [vmem:[%s4967_s5 + $0x28] sm:$0xff] }
0x1109   :  { %1547 = vrot.lane.b32.xlu0 %v1521_v14, %s4220_s17  ;;  %v1953_v14 = vld [vmem:[%s4967_s5 + $0x38] sm:$0xff] }
0x110e   :  { %v1543_v16 = vpop.permute.xlu1 %1542 }
0x110f   :  { %v1545_v18 = vmul.f32 %v3952_v5, %v1543_v16  ;;  %v1947_v5 = vld [vmem:[%s4967_s5 + $0x8] sm:$0xff]  ;;  %v3749_v16 = vpack.c.bf16 %v1948_v13, %v1946_v11  ;;  %v1959_v11 = vld [vmem:[#allocation8 + $0x28] sm:$0xff] }
0x1110   :  { %v3747_v45 = vpack.c.bf16 %v1949_v44, %v1947_v5  ;;  %v1961_v13 = vld [vmem:[#allocation8 + $0x38] sm:$0xff] }
0x1111   :  { %1623 = vrot.lane.b32.xlu1 %v1545_v18, %s4220_s17  ;;  %v3751_v18 = vpack.c.bf16 %v1953_v14, %v1951_v52  ;;  %v3743_v52 = vpack.c.bf16 %v1961_v13, %v1959_v11  ;;  %v1958_v14 = vld [vmem:[#allocation8 + $0x20] sm:$0xff] }
0x117b   :  { %v4689_v12 = vpop.permute.xlu0 %1547 }
0x117c   :  { %3505 = vmatmul.mubr.msk.f32.vlgmr.msra.gmra.mrb[14].mxu0 %vm352_vm10, %v4689_v12 }
0x117d   :  { %3729 = vmatpush3.bf16.msra.mxu0 %v4395_v24  ;;  %3526 = vmatprep.mubr.msk.f32.mxu0 %vm4218_vm8, %v4216_v2  ;;  %v334_v24 = vadd.f32 %v4467_v53, %v4479_v58 }
0x117e   :  { %3730 = vmatprep.subr.bf16.mxu0 %v4217_v17 }
0x1181   :  { %3732 = vmatpush3.bf16.msra.mxu0 %v4402_v30 }
0x1182   :  { %3748 = vmatprep.subr.bf16.mxu0 %v3747_v45 }
0x1183   :  { %v4698_v55 = vpop.permute.xlu1 %1623 }
0x1184   :  { %3516 = vmatmul.mubr.msk.f32.vlgmr.msra.gmra.mrb[26].mxu1 %vm352_vm10, %v4698_v55 }
0x1185   :  { %3735 = vmatpush3.bf16.msra.mxu1 %v4432_v40  ;;  %3537 = vmatprep.mubr.msk.f32.mxu1 %vm4218_vm8, %v4216_v2 }
0x1186   :  { %3736 = vmatprep.subr.bf16.mxu1 %v4217_v17 }
0x1189   :  { %3738 = vmatpush3.bf16.msra.mxu1 %v4436_v43 }
0x124f   :  { %v1617_v21 = vpop.f32.mrb[14].mxu0 }
0x1250   :  { %v1621_v25 = vadd.f32 %v1617_v21, %v334_v24  ;;  %v3506_v30 = vpop.f32.mrb[15].mxu0  ;;  %v1950_v24 = vld [vmem:[%s4967_s5 + $0x20] sm:$0xff]  ;;  %v1952_v21 = vld [vmem:[%s4967_s5 + $0x30] sm:$0xff] }
0x1251   :  { %v3753_v30 = vpack.c.bf16 %v1952_v21, %v1950_v24 }
0x1252   :  { %3957 = vtanh.f32 %v1621_v25  ;;  %v3198_v43 = vmul.f32 -1.442695, %v1621_v25 }
0x1257   :  { %v1693_v32 = vpop.f32.mrb[26].mxu1 }
0x1258   :  { %v1697_v26 = vadd.f32 %v1693_v32, %v306_v27  ;;  %v3517_v40 = vpop.f32.mrb[27].mxu1 }
0x125a   :  { %3959 = vtanh.f32 %v1697_v26  ;;  %v3199_v53 = vmul.f32 -1.442695, %v1697_v26 }
0x125b   :  { %3961 = vpow2.f32 %v3198_v43 }
0x125c   :  { %v3958_v33 = vpop.eup %3957  ;;  %3963 = vpow2.f32 %v3199_v53 }
0x125d   :  { %1707 = vrot.lane.b32.xlu0 %v3958_v33, %s4219_s2 }
0x1264   :  { %v3960_v34 = vpop.eup %3959 }
0x1265   :  { %1731 = vrot.lane.b32.xlu1 %v3960_v34, %s4219_s2  ;;  %v3962_v29 = vpop.eup %3961 }
0x1266   :  { %v1701_v23 = vadd.f32 1.0, %v3962_v29  ;;  %v3964_v36 = vpop.eup %3963 }
0x1267   :  { %v1725_v37 = vadd.f32 1.0, %v3964_v36 }
0x1268   :  { %3965 = vrcp.f32 %v1701_v23 }
0x1269   :  { %3967 = vrcp.f32 %v1725_v37 }
0x1272   :  { %v3966_v56 = vpop.eup %3965 }
0x1273   :  { %v3968_v60 = vpop.eup %3967  ;;  %v1705_v63 = vmul.f32 %v3966_v56, %v1515_v8 }
0x1274   :  { %v1729_v48 = vmul.f32 %v3968_v60, %v1539_v10 }
0x12cf   :  { %v1708_v39 = vpop.permute.xlu0 %1707 }
0x12d0   :  { %v1710_v59 = vmul.f32 %v3966_v56, %v1708_v39 }
0x12d2   :  { %1712 = vrot.lane.b32.xlu0 %v1710_v59, %s4219_s2 }
0x12d7   :  { %v1732_v49 = vpop.permute.xlu1 %1731 }
0x12d8   :  { %v1734_v61 = vmul.f32 %v3968_v60, %v1732_v49 }
0x12da   :  { %1736 = vrot.lane.b32.xlu1 %v1734_v61, %s4219_s2 }
0x1344   :  { %v1713_v0 = vpop.permute.xlu0 %1712 }
0x1345   :  { %v4715_v46 = vadd.f32 %v1713_v0, %v1705_v63  ;;  %v2205_v0 = vld [vmem:[%s4970_s8] sm:$0xff] }
0x1347   :  { %3969 = vtanh.f32 %v4715_v46 }
0x134c   :  { %v1737_v3 = vpop.permute.xlu1 %1736 }
0x134d   :  { %v4718_v4 = vadd.f32 %v1737_v3, %v1729_v48  ;;  %v2206_v48 = vld [vmem:[%s4970_s8 + $0x8] sm:$0xff] }
0x134e   :  { %v4796_v3 = vpack.c.bf16 %v2206_v48, %v2205_v0 }
0x134f   :  { %3971 = vtanh.f32 %v4718_v4 }
0x1351   :  { %v3970_v6 = vpop.eup %3969 }
0x1352   :  { %1718 = vrot.lane.b32.xlu0 %v3970_v6, %s4219_s2  ;;  %v1955_v6 = vld [vmem:[#allocation8 + $0x8] sm:$0xff] }
0x1359   :  { %v3972_v7 = vpop.eup %3971 }
0x135a   :  { %1742 = vrot.lane.b32.xlu1 %v3972_v7, %s4219_s2  ;;  %v1957_v7 = vld [vmem:[#allocation8 + $0x18] sm:$0xff] }
0x13c4   :  { %v1719_v8 = vpop.permute.xlu0 %1718 }
0x13c5   :  { %v1721_v9 = vmul.f32 %v3966_v56, %v1719_v8  ;;  %v3739_v8 = vpack.c.bf16 %v1957_v7, %v1955_v6 }
0x13c7   :  { %1747 = vrot.lane.b32.xlu0 %v1721_v9, %s4220_s17  ;;  %v1954_v9 = vld [vmem:[#allocation8] sm:$0xff]  ;;  %3740 = vmatprep.subr.bf16.mxu1 %v3739_v8 }
0x13cc   :  { %v1743_v47 = vpop.permute.xlu1 %1742 }
0x13cd   :  { %v1745_v10 = vmul.f32 %v3968_v60, %v1743_v47  ;;  %v1956_v47 = vld [vmem:[#allocation8 + $0x10] sm:$0xff] }
0x13cf   :  { %1823 = vrot.lane.b32.xlu1 %v1745_v10, %s4220_s17  ;;  %v3741_v10 = vpack.c.bf16 %v1956_v47, %v1954_v9 }
0x1439   :  { %v1748_v25 = vpop.permute.xlu0 %1747 }
0x143a   :  { %3527 = vmatmul.mubr.msk.f32.vlgmr.msra.gmra.mrb[16].mxu0 %vm352_vm10, %v1748_v25 }
0x143b   :  { %3750 = vmatpush1.bf16.msra.mxu0 %v3749_v16  ;;  %2142 = vmatprep.mubr.f32.mxu0 %v4216_v2  ;;  %v1960_v16 = vld [vmem:[#allocation8 + $0x30] sm:$0xff] }
0x143c   :  { %3752 = vmatprep.subr.bf16.mxu0 %v3751_v18  ;;  %v3745_v18 = vpack.c.bf16 %v1960_v16, %v1958_v14 }
0x143f   :  { %3754 = vmatpush1.bf16.msra.mxu0 %v3753_v30 }
0x1440   :  { %3755 = vmatprep.subr.bf16.mxu0 %v4217_v17 }
0x1441   :  { %v4752_v27 = vpop.permute.xlu1 %1823 }
0x1442   :  { %3538 = vmatmul.mubr.msk.f32.vlgmr.msra.gmra.mrb[28].mxu1 %vm352_vm10, %v4752_v27  ;;  %3212 = vmatmul.mubr.msk.f32.vlgmr.msra.gmra.mrb[18].mxu0 %vm352_vm10, %v4509_v41  ;;  %v340_v41 = vadd.f32 %v4475_v57, %v4479_v58 }
0x1443   :  { %2147 = vmatprep.mubr.f32.mxu0 %v4216_v2  ;;  %2031 = vmatprep.mubr.f32.mxu1 %v4216_v2 }
0x1444   :  { %3757 = vmatpush3.bf16.msra.mxu0 %v4796_v3  ;;  %3742 = vmatpush1.bf16.msra.mxu1 %v3741_v10 }
0x1445   :  { %3758 = vmatprep.subr.bf16.mxu0 %v4217_v17  ;;  %3744 = vmatprep.subr.bf16.mxu1 %v3743_v52 }
0x1446   :  { %3213 = vmatmul.mubr.msk.f32.gmra.mrb[20].mxu0 %vm352_vm10, %v4558_v38 }
0x1447   :  { %2152 = vmatprep.mubr.f32.mxu0 %v4216_v2 }
0x1448   :  { %3746 = vmatpush1.bf16.msra.mxu1 %v3745_v18 }
0x1449   :  { %3761 = vmatprep.subr.bf16.mxu1 %v4217_v17 }
0x144a   :  { %3214 = vmatmul.mubr.msk.f32.gmra.mrb[22].mxu0 %vm352_vm10, %v4593_v35 }
0x144b   :  { %2157 = vmatprep.mubr.f32.mxu0 %v4216_v2 }
0x144e   :  { %3215 = vmatmul.mubr.msk.f32.gmra.mrb[24].mxu0 %vm352_vm10, %v4625_v22 }
0x144f   :  { %2162 = vmatprep.mubr.f32.mxu0 %v4216_v2 }
0x1452   :  { %3216 = vmatmul.mubr.msk.f32.gmra.mrb[26].mxu0 %vm352_vm10, %v4657_v15  ;;  %v300_v15 = vadd.f32 %v4463_v51, %v4485_v1 }
0x1453   :  { %2167 = vmatprep.mubr.f32.mxu0 %v4216_v2 }
0x1456   :  { %3217 = vmatmul.mubr.msk.f32.gmra.mrb[28].mxu0 %vm352_vm10, %v4689_v12 }
0x1457   :  { %2172 = vmatprep.mubr.f32.mxu0 %v4216_v2 }
0x145a   :  { %3218 = vmatmul.mubr.msk.f32.gmra.mrb[30].mxu0 %vm352_vm10, %v1748_v25 }
0x145b   :  { %2177 = vmatprep.mubr.f32.mxu0 %v4216_v2 }
0x150d   :  { %v1817_v38 = vpop.f32.mrb[16].mxu0 }
0x150e   :  { %v1821_v35 = vadd.f32 %v1817_v38, %v340_v41  ;;  %v3528_v22 = vpop.f32.mrb[17].mxu0  ;;  %v2209_v38 = vld [vmem:[#allocation11] sm:$0xff] }
0x1510   :  { %3973 = vtanh.f32 %v1821_v35  ;;  %v3202_v34 = vmul.f32 -1.442695, %v1821_v35  ;;  %v2210_v35 = vld [vmem:[#allocation11 + $0x8] sm:$0xff] }
0x1511   :  { %v3762_v22 = vpack.c.bf16 %v2210_v35, %v2209_v38 }
0x1515   :  { %v1893_v32 = vpop.f32.mrb[28].mxu1 }
0x1516   :  { %v1897_v26 = vadd.f32 %v1893_v32, %v300_v15  ;;  %v3539_v40 = vpop.f32.mrb[29].mxu1  ;;  %v2211_v15 = vld [vmem:[#allocation11 + $0x10] sm:$0xff]  ;;  %v2212_v32 = vld [vmem:[#allocation11 + $0x18] sm:$0xff] }
0x1517   :  { %v3765_v40 = vpack.c.bf16 %v2212_v32, %v2211_v15 }
0x1518   :  { %3975 = vtanh.f32 %v1897_v26  ;;  %v3203_v57 = vmul.f32 -1.442695, %v1897_v26 }
0x1519   :  { %3977 = vpow2.f32 %v3202_v34 }
0x151a   :  { %v3974_v12 = vpop.eup %3973  ;;  %3979 = vpow2.f32 %v3203_v57 }
0x151b   :  { %1907 = vrot.lane.b32.xlu0 %v3974_v12, %s4219_s2 }
0x1522   :  { %v3976_v33 = vpop.eup %3975 }
0x1523   :  { %1931 = vrot.lane.b32.xlu1 %v3976_v33, %s4219_s2  ;;  %v3978_v58 = vpop.eup %3977 }
0x1524   :  { %v1901_v43 = vadd.f32 1.0, %v3978_v58  ;;  %v3980_v53 = vpop.eup %3979 }
0x1525   :  { %v1925_v29 = vadd.f32 1.0, %v3980_v53 }
0x1526   :  { %3981 = vrcp.f32 %v1901_v43 }
0x1527   :  { %3983 = vrcp.f32 %v1925_v29 }
0x1530   :  { %v3982_v51 = vpop.eup %3981 }
0x1531   :  { %v3984_v36 = vpop.eup %3983  ;;  %v1905_v39 = vmul.f32 %v3982_v51, %v4715_v46  ;;  %v2207_v46 = vld [vmem:[%s4970_s8 + $0x10] sm:$0xff] }
0x1532   :  { %v1929_v49 = vmul.f32 %v3984_v36, %v4718_v4  ;;  %v2208_v4 = vld [vmem:[%s4970_s8 + $0x18] sm:$0xff] }
0x1533   :  { %v4803_v44 = vpack.c.bf16 %v2208_v4, %v2207_v46 }
0x1535   :  { %3760 = vmatpush3.bf16.msra.mxu0 %v4803_v44 }
0x1536   :  { %3767 = vmatprep.subr.bf16.mxu0 %v4217_v17 }
0x158d   :  { %v1908_v1 = vpop.permute.xlu0 %1907 }
0x158e   :  { %v1910_v23 = vmul.f32 %v3982_v51, %v1908_v1 }
0x1590   :  { %1912 = vrot.lane.b32.xlu0 %v1910_v23, %s4219_s2 }
0x1595   :  { %v1932_v37 = vpop.permute.xlu1 %1931 }
0x1596   :  { %v1934_v56 = vmul.f32 %v3984_v36, %v1932_v37 }
0x1598   :  { %1936 = vrot.lane.b32.xlu1 %v1934_v56, %s4219_s2 }
0x1602   :  { %v1913_v59 = vpop.permute.xlu0 %1912 }
0x1603   :  { %v1915_v60 = vadd.f32 %v1913_v59, %v1905_v39 }
0x1605   :  { %3985 = vtanh.f32 %v1915_v60 }
0x160a   :  { %v1937_v61 = vpop.permute.xlu1 %1936 }
0x160b   :  { %v1939_v63 = vadd.f32 %v1937_v61, %v1929_v49 }
0x160d   :  { %3987 = vtanh.f32 %v1939_v63 }
0x160f   :  { %v3986_v5 = vpop.eup %3985 }
0x1610   :  { %1918 = vrot.lane.b32.xlu0 %v3986_v5, %s4219_s2 }
0x1617   :  { %v3988_v45 = vpop.eup %3987 }
0x1618   :  { %1942 = vrot.lane.b32.xlu1 %v3988_v45, %s4219_s2 }
0x1682   :  { %v1919_v24 = vpop.permute.xlu0 %1918 }
0x1683   :  { %v1921_v21 = vmul.f32 %v3982_v51, %v1919_v24 }
0x1685   :  { %2074 = vrot.lane.b32.xlu0 %v1921_v21, %s4220_s17 }
0x168a   :  { %v1943_v25 = vpop.permute.xlu1 %1942 }
0x168b   :  { %v1945_v30 = vmul.f32 %v3984_v36, %v1943_v25 }
0x168d   :  { %1963 = vrot.lane.b32.xlu1 %v1945_v30, %s4220_s17 }
0x16f7   :  { %v2075_v41 = vpop.permute.xlu0 %2074 }
0x16f8   :  { %3219 = vmatmul.mubr.msk.f32.gmra.mrb[32].mxu0 %vm352_vm10, %v2075_v41 }
0x16f9   :  { %3548 = vmatprep.mubr.msk.f32.mxu0 %vm4218_vm8, %v4216_v2 }
0x16fc   :  { %3549 = vmatmul.mubr.f32.vlgmr.msra.gmra.mrb[18].mxu0 %v4216_v2 }
0x16fd   :  { %3769 = vmatpush3.bf16.msra.mxu0 %v4796_v3  ;;  %3570 = vmatprep.mubr.msk.f32.mxu0 %vm4218_vm8, %v4216_v2 }
0x16fe   :  { %3770 = vmatprep.subr.bf16.mxu0 %v4217_v17 }
0x16ff   :  { %v1964_v26 = vpop.permute.xlu1 %1963 }
0x1700   :  { %3204 = vmatmul.mubr.msk.f32.vlgmr.msra.gmra.mrb[30].mxu1 %vm352_vm10, %v1964_v26 }
0x1701   :  { %2036 = vmatprep.mubr.f32.mxu1 %v4216_v2  ;;  %3763 = vmatpush3.bf16.msra.mxu1 %v3762_v22 }
0x1702   :  { %3764 = vmatprep.subr.bf16.mxu1 %v4217_v17  ;;  %3772 = vmatpush3.bf16.msra.mxu0 %v4803_v44 }
0x1703   :  { %3773 = vmatprep.subr.bf16.mxu0 %v4217_v17 }
0x1704   :  { %3205 = vmatmul.mubr.msk.f32.gmra.mrb[32].mxu1 %vm352_vm10, %v4752_v27 }
0x1705   :  { %2041 = vmatprep.mubr.f32.mxu1 %v4216_v2  ;;  %3766 = vmatpush3.bf16.msra.mxu1 %v3765_v40 }
0x1706   :  { %3803 = vmatprep.subr.bf16.mxu1 %v4217_v17 }
0x1708   :  { %3206 = vmatmul.mubr.msk.f32.gmra.mrb[34].mxu1 %vm352_vm10, %v4698_v55 }
0x1709   :  { %2046 = vmatprep.mubr.f32.mxu1 %v4216_v2 }
0x170c   :  { %3207 = vmatmul.mubr.msk.f32.gmra.mrb[36].mxu1 %vm352_vm10, %v4667_v20 }
0x170d   :  { %2051 = vmatprep.mubr.f32.mxu1 %v4216_v2 }
0x1710   :  { %3208 = vmatmul.mubr.msk.f32.gmra.mrb[38].mxu1 %vm352_vm10, %v4635_v31  ;;  %v2184_v31 = vld [vmem:[#allocation10] sm:$0x3] }
0x1711   :  { %2056 = vmatprep.mubr.f32.mxu1 %v4216_v2  ;;  %v2193_v46 = vrot.slane %v2184_v31, %v195_v62 }
0x1714   :  { %3209 = vmatmul.mubr.msk.f32.gmra.mrb[40].mxu1 %vm352_vm10, %v4603_v28 }
0x1715   :  { %2061 = vmatprep.mubr.f32.mxu1 %v4216_v2 }
0x1718   :  { %3210 = vmatmul.mubr.msk.f32.gmra.mrb[42].mxu1 %vm352_vm10, %v4568_v19 }
0x1719   :  { %2066 = vmatprep.mubr.f32.mxu1 %v4216_v2 }
0x171c   :  { %3211 = vmatmul.mubr.msk.f32.gmra.mrb[44].mxu1 %vm352_vm10, %v4519_v42  ;;  %v2189_v42 = vrot.slane %v2184_v31, %v191_v54 }
0x171d   :  { %3559 = vmatprep.mubr.msk.f32.mxu1 %vm4218_vm8, %v4216_v2 }
0x1720   :  { %3560 = vmatmul.mubr.f32.vlgmr.msra.gmra.mrb[46].mxu1 %v4216_v2 }
0x1721   :  { %3805 = vmatpush3.bf16.msra.mxu1 %v4796_v3  ;;  %3636 = vmatprep.mubr.msk.f32.mxu1 %vm4218_vm8, %v4216_v2 }
0x1722   :  { %3806 = vmatprep.subr.bf16.mxu1 %v4217_v17 }
0x1725   :  { %3808 = vmatpush3.bf16.msra.mxu1 %v4803_v44 }
0x17cb   :  { %v2179_v19 = vpop.f32.mrb[32].mxu0 }
0x17cc   :  { %v2181_v28 = vpop.f32.mrb[33].mxu0 }
0x17cf   :  { %v2279_v20 = vpop.f32.mrb[18].mxu0 }
0x17d0   :  { %v3550_v55 = vpop.f32.mrb[19].mxu0 }
0x17d3   :  { %v2033_v27 = vpop.f32.mrb[30].mxu1 }
0x17d4   :  { %v3813_v12 = vadd.f32 %v2189_v42, %v2033_v27  ;;  %v2035_v33 = vpop.f32.mrb[31].mxu1 }
0x17d6   :  { %v3814_v34 = vadd.f32 %v3813_v12, %v2279_v20 }
0x17d7   :  { %v2038_v57 = vpop.f32.mrb[32].mxu1 }
0x17d8   :  { %3989 = vtanh.f32 %v3814_v34  ;;  %v3815_v58 = vadd.f32 %v2189_v42, %v2038_v57  ;;  %v2040_v43 = vpop.f32.mrb[33].mxu1  ;;  %v3220_v10 = vmul.f32 -1.442695, %v3814_v34 }
0x17da   :  { %3991 = vpow2.f32 %v3220_v10 }
0x17db   :  { %v2043_v53 = vpop.f32.mrb[34].mxu1 }
0x17dc   :  { %v4856_v29 = vadd.f32 %v2189_v42, %v2043_v53  ;;  %v2045_v51 = vpop.f32.mrb[35].mxu1 }
0x17df   :  { %v2048_v1 = vpop.f32.mrb[36].mxu1 }
0x17e0   :  { %v4858_v23 = vadd.f32 %v2189_v42, %v2048_v1  ;;  %v2050_v36 = vpop.f32.mrb[37].mxu1 }
0x17e2   :  { %v3990_v37 = vpop.eup %3989 }
0x17e3   :  { %2364 = vrot.lane.b32.xlu0 %v3990_v37, %s4219_s2  ;;  %v2053_v54 = vpop.f32.mrb[38].mxu1 }
0x17e4   :  { %v4861_v56 = vadd.f32 %v2189_v42, %v2053_v54  ;;  %v2055_v39 = vpop.f32.mrb[39].mxu1  ;;  %v3992_v11 = vpop.eup %3991 }
0x17e5   :  { %v2358_v13 = vadd.f32 1.0, %v3992_v11 }
0x17e7   :  { %v2058_v59 = vpop.f32.mrb[40].mxu1  ;;  %3993 = vrcp.f32 %v2358_v13 }
0x17e8   :  { %v4863_v60 = vadd.f32 %v2189_v42, %v2058_v59  ;;  %v2060_v49 = vpop.f32.mrb[41].mxu1 }
0x17eb   :  { %v2063_v61 = vpop.f32.mrb[42].mxu1 }
0x17ec   :  { %v4865_v63 = vadd.f32 %v2189_v42, %v2063_v61  ;;  %v2065_v0 = vpop.f32.mrb[43].mxu1 }
0x17ef   :  { %v2068_v48 = vpop.f32.mrb[44].mxu1 }
0x17f0   :  { %v2180_v4 = vadd.f32 %v2179_v19, %v2068_v48  ;;  %v2070_v5 = vpop.f32.mrb[45].mxu1 }
0x17f1   :  { %v2182_v45 = vadd.f32 %v2181_v28, %v2070_v5  ;;  %v3994_v52 = vpop.eup %3993 }
0x17f2   :  { %v4869_v6 = vadd.f32 %v2189_v42, %v2180_v4  ;;  %v2362_v50 = vmul.f32 0.0, %v3994_v52 }
0x17f3   :  { %v2204_v7 = vadd.f32 %v2193_v46, %v2182_v45  ;;  %v2350_v8 = vpop.f32.mrb[46].mxu1 }
0x17f4   :  { %v3561_v9 = vpop.f32.mrb[47].mxu1 }
0x17f5   :  { %v4871_v47 = vadd.f32 %v2350_v8, %v2204_v7 }
0x1855   :  { %v2365_v14 = vpop.permute.xlu0 %2364 }
0x1856   :  { %v2367_v16 = vmul.f32 %v3994_v52, %v2365_v14 }
0x1858   :  { %2369 = vrot.lane.b32.xlu1 %v2367_v16, %s4219_s2 }
0x18ca   :  { %v2370_v62 = vpop.permute.xlu1 %2369 }
0x18cb   :  { %v2372_v18 = vadd.f32 %v2370_v62, %v2362_v50 }
0x18cd   :  { %3995 = vtanh.f32 %v2372_v18 }
0x18d7   :  { %v3996_v24 = vpop.eup %3995 }
0x18d8   :  { %2375 = vrot.lane.b32.xlu0 %v3996_v24, %s4219_s2 }
0x194a   :  { %v2376_v21 = vpop.permute.xlu0 %2375 }
0x194b   :  { %v2378_v25 = vmul.f32 %v3994_v52, %v2376_v21 }
0x194d   :  { %2404 = vrot.lane.b32.xlu1 %v2378_v25, %s4220_s17 }
0x19bf   :  { %v2405_v30 = vpop.permute.xlu1 %2404 }
0x19c0   :  { %3571 = vmatmul.mubr.msk.f32.vlgmr.msra.gmra.mrb[20].mxu0 %vm352_vm10, %v2405_v30 }
0x19c1   :  { %3775 = vmatpush3.bf16.msra.mxu0 %v4796_v3  ;;  %3581 = vmatprep.mubr.msk.f32.mxu0 %vm4218_vm8, %v4216_v2 }
0x19c2   :  { %3776 = vmatprep.subr.bf16.mxu0 %v4217_v17 }
0x19c5   :  { %3778 = vmatpush3.bf16.msra.mxu0 %v4803_v44 }
0x19c6   :  { %3779 = vmatprep.subr.bf16.mxu0 %v4217_v17 }
0x1a93   :  { %v2474_v41 = vpop.f32.mrb[20].mxu0 }
0x1a94   :  { %v3816_v38 = vadd.f32 %v3815_v58, %v2474_v41  ;;  %v3572_v35 = vpop.f32.mrb[21].mxu0 }
0x1a96   :  { %3997 = vtanh.f32 %v3816_v38  ;;  %v3223_v15 = vmul.f32 -1.442695, %v3816_v38 }
0x1a98   :  { %3999 = vpow2.f32 %v3223_v15 }
0x1aa0   :  { %v3998_v22 = vpop.eup %3997 }
0x1aa1   :  { %2488 = vrot.lane.b32.xlu0 %v3998_v22, %s4219_s2 }
0x1aa2   :  { %v4000_v32 = vpop.eup %3999 }
0x1aa3   :  { %v2482_v26 = vadd.f32 1.0, %v4000_v32 }
0x1aa5   :  { %4001 = vrcp.f32 %v2482_v26 }
0x1aaf   :  { %v4002_v40 = vpop.eup %4001 }
0x1ab0   :  { %v2486_v31 = vmul.f32 %v4002_v40, %v2372_v18 }
0x1b13   :  { %v2489_v19 = vpop.permute.xlu0 %2488 }
0x1b14   :  { %v2491_v28 = vmul.f32 %v4002_v40, %v2489_v19 }
0x1b16   :  { %2493 = vrot.lane.b32.xlu1 %v2491_v28, %s4219_s2 }
0x1b88   :  { %v2494_v20 = vpop.permute.xlu1 %2493 }
0x1b89   :  { %v2496_v55 = vadd.f32 %v2494_v20, %v2486_v31 }
0x1b8b   :  { %4003 = vtanh.f32 %v2496_v55 }
0x1b95   :  { %v4004_v42 = vpop.eup %4003 }
0x1b96   :  { %2499 = vrot.lane.b32.xlu0 %v4004_v42, %s4219_s2 }
0x1c08   :  { %v2500_v27 = vpop.permute.xlu0 %2499 }
0x1c09   :  { %v2502_v12 = vmul.f32 %v4002_v40, %v2500_v27 }
0x1c0b   :  { %2504 = vrot.lane.b32.xlu1 %v2502_v12, %s4220_s17 }
0x1c7d   :  { %v2505_v33 = vpop.permute.xlu1 %2504 }
0x1c7e   :  { %3582 = vmatmul.mubr.msk.f32.vlgmr.msra.gmra.mrb[22].mxu0 %vm352_vm10, %v2505_v33 }
0x1c7f   :  { %3781 = vmatpush3.bf16.msra.mxu0 %v4796_v3  ;;  %3592 = vmatprep.mubr.msk.f32.mxu0 %vm4218_vm8, %v4216_v2 }
0x1c80   :  { %3782 = vmatprep.subr.bf16.mxu0 %v4217_v17 }
0x1c83   :  { %3784 = vmatpush3.bf16.msra.mxu0 %v4803_v44 }
0x1c84   :  { %3785 = vmatprep.subr.bf16.mxu0 %v4217_v17 }
0x1d51   :  { %v2574_v34 = vpop.f32.mrb[22].mxu0 }
0x1d52   :  { %v3818_v57 = vadd.f32 %v4856_v29, %v2574_v34  ;;  %v3583_v58 = vpop.f32.mrb[23].mxu0 }
0x1d54   :  { %4005 = vtanh.f32 %v3818_v57  ;;  %v3225_v53 = vmul.f32 -1.442695, %v3818_v57 }
0x1d56   :  { %4007 = vpow2.f32 %v3225_v53 }
0x1d5e   :  { %v4006_v43 = vpop.eup %4005 }
0x1d5f   :  { %2588 = vrot.lane.b32.xlu0 %v4006_v43, %s4219_s2 }
0x1d60   :  { %v4008_v51 = vpop.eup %4007 }
0x1d61   :  { %v2582_v1 = vadd.f32 1.0, %v4008_v51 }
0x1d63   :  { %4009 = vrcp.f32 %v2582_v1 }
0x1d6d   :  { %v4010_v36 = vpop.eup %4009 }
0x1d6e   :  { %v2586_v39 = vmul.f32 %v4010_v36, %v2496_v55 }
0x1dd1   :  { %v2589_v37 = vpop.permute.xlu0 %2588 }
0x1dd2   :  { %v2591_v54 = vmul.f32 %v4010_v36, %v2589_v37 }
0x1dd4   :  { %2593 = vrot.lane.b32.xlu1 %v2591_v54, %s4219_s2 }
0x1e46   :  { %v2594_v59 = vpop.permute.xlu1 %2593 }
0x1e47   :  { %v2596_v49 = vadd.f32 %v2594_v59, %v2586_v39 }
0x1e49   :  { %4011 = vtanh.f32 %v2596_v49 }
0x1e53   :  { %v4012_v29 = vpop.eup %4011 }
0x1e54   :  { %2599 = vrot.lane.b32.xlu0 %v4012_v29, %s4219_s2 }
0x1ec6   :  { %v2600_v61 = vpop.permute.xlu0 %2599 }
0x1ec7   :  { %v2602_v0 = vmul.f32 %v4010_v36, %v2600_v61 }
0x1ec9   :  { %2604 = vrot.lane.b32.xlu1 %v2602_v0, %s4220_s17 }
0x1f3b   :  { %v2605_v48 = vpop.permute.xlu1 %2604 }
0x1f3c   :  { %3593 = vmatmul.mubr.msk.f32.vlgmr.msra.gmra.mrb[24].mxu0 %vm352_vm10, %v2605_v48 }
0x1f3d   :  { %3787 = vmatpush3.bf16.msra.mxu0 %v4796_v3  ;;  %3603 = vmatprep.mubr.msk.f32.mxu0 %vm4218_vm8, %v4216_v2 }
0x1f3e   :  { %3788 = vmatprep.subr.bf16.mxu0 %v4217_v17 }
0x1f41   :  { %3790 = vmatpush3.bf16.msra.mxu0 %v4803_v44 }
0x1f42   :  { %3791 = vmatprep.subr.bf16.mxu0 %v4217_v17 }
0x200f   :  { %v2674_v46 = vpop.f32.mrb[24].mxu0 }
0x2010   :  { %v3820_v4 = vadd.f32 %v4858_v23, %v2674_v46  ;;  %v3594_v5 = vpop.f32.mrb[25].mxu0 }
0x2012   :  { %4013 = vtanh.f32 %v3820_v4  ;;  %v3227_v7 = vmul.f32 -1.442695, %v3820_v4 }
0x2014   :  { %4015 = vpow2.f32 %v3227_v7  ;;  %v3221_v7 = vmul.f32 -1.442695, %v4871_v47 }
0x201c   :  { %v4014_v45 = vpop.eup %4013 }
0x201d   :  { %2688 = vrot.lane.b32.xlu0 %v4014_v45, %s4219_s2 }
0x201e   :  { %v4016_v8 = vpop.eup %4015 }
0x201f   :  { %v2682_v9 = vadd.f32 1.0, %v4016_v8 }
0x2021   :  { %4017 = vrcp.f32 %v2682_v9 }
0x202b   :  { %v4018_v10 = vpop.eup %4017 }
0x202c   :  { %v2686_v52 = vmul.f32 %v4018_v10, %v2596_v49 }
0x208f   :  { %v2689_v11 = vpop.permute.xlu0 %2688 }
0x2090   :  { %v2691_v13 = vmul.f32 %v4018_v10, %v2689_v11 }
0x2092   :  { %2693 = vrot.lane.b32.xlu1 %v2691_v13, %s4219_s2 }
0x2104   :  { %v2694_v14 = vpop.permute.xlu1 %2693 }
0x2105   :  { %v2696_v16 = vadd.f32 %v2694_v14, %v2686_v52 }
0x2107   :  { %4019 = vtanh.f32 %v2696_v16 }
0x2111   :  { %v4020_v23 = vpop.eup %4019 }
0x2112   :  { %2699 = vrot.lane.b32.xlu0 %v4020_v23, %s4219_s2 }
0x2184   :  { %v2700_v50 = vpop.permute.xlu0 %2699 }
0x2185   :  { %v2702_v62 = vmul.f32 %v4018_v10, %v2700_v50 }
0x2187   :  { %2704 = vrot.lane.b32.xlu1 %v2702_v62, %s4220_s17 }
0x21f9   :  { %v2705_v18 = vpop.permute.xlu1 %2704 }
0x21fa   :  { %3604 = vmatmul.mubr.msk.f32.vlgmr.msra.gmra.mrb[26].mxu0 %vm352_vm10, %v2705_v18 }
0x21fb   :  { %3793 = vmatpush3.bf16.msra.mxu0 %v4796_v3  ;;  %3614 = vmatprep.mubr.msk.f32.mxu0 %vm4218_vm8, %v4216_v2 }
0x21fc   :  { %3794 = vmatprep.subr.bf16.mxu0 %v4217_v17 }
0x21ff   :  { %3796 = vmatpush3.bf16.msra.mxu0 %v4803_v44 }
0x2200   :  { %3797 = vmatprep.subr.bf16.mxu0 %v4217_v17 }
0x22cd   :  { %v2774_v24 = vpop.f32.mrb[26].mxu0 }
0x22ce   :  { %v3822_v21 = vadd.f32 %v4861_v56, %v2774_v24  ;;  %v3605_v25 = vpop.f32.mrb[27].mxu0 }
0x22d0   :  { %4021 = vtanh.f32 %v3822_v21  ;;  %v3229_v41 = vmul.f32 -1.442695, %v3822_v21 }
0x22d2   :  { %4023 = vpow2.f32 %v3229_v41 }
0x22da   :  { %v4022_v30 = vpop.eup %4021 }
0x22db   :  { %2788 = vrot.lane.b32.xlu0 %v4022_v30, %s4219_s2 }
0x22dc   :  { %v4024_v38 = vpop.eup %4023 }
0x22dd   :  { %v2782_v35 = vadd.f32 1.0, %v4024_v38 }
0x22df   :  { %4025 = vrcp.f32 %v2782_v35 }
0x22e9   :  { %v4026_v22 = vpop.eup %4025 }
0x22ea   :  { %v2786_v26 = vmul.f32 %v4026_v22, %v2696_v16 }
0x234d   :  { %v2789_v15 = vpop.permute.xlu0 %2788 }
0x234e   :  { %v2791_v32 = vmul.f32 %v4026_v22, %v2789_v15 }
0x2350   :  { %2793 = vrot.lane.b32.xlu1 %v2791_v32, %s4219_s2  ;;  %v3236_v32 = vld [vmem:[%s4972_s10] ss:$0 sm:$0xff] }
0x23c2   :  { %v2794_v40 = vpop.permute.xlu1 %2793 }
0x23c3   :  { %v2796_v19 = vadd.f32 %v2794_v40, %v2786_v26 }
0x23c5   :  { %4027 = vtanh.f32 %v2796_v19 }
0x23cf   :  { %v4028_v56 = vpop.eup %4027 }
0x23d0   :  { %2799 = vrot.lane.b32.xlu0 %v4028_v56, %s4219_s2 }
0x2442   :  { %v2800_v28 = vpop.permute.xlu0 %2799 }
0x2443   :  { %v2802_v31 = vmul.f32 %v4026_v22, %v2800_v28 }
0x2445   :  { %2804 = vrot.lane.b32.xlu1 %v2802_v31, %s4220_s17 }
0x24b7   :  { %v2805_v20 = vpop.permute.xlu1 %2804 }
0x24b8   :  { %3615 = vmatmul.mubr.msk.f32.vlgmr.msra.gmra.mrb[28].mxu0 %vm352_vm10, %v2805_v20 }
0x24b9   :  { %3799 = vmatpush3.bf16.msra.mxu0 %v4796_v3  ;;  %3625 = vmatprep.mubr.msk.f32.mxu0 %vm4218_vm8, %v4216_v2 }
0x24ba   :  { %3800 = vmatprep.subr.bf16.mxu0 %v4217_v17 }
0x24bd   :  { %3802 = vmatpush3.bf16.msra.mxu0 %v4803_v44 }
0x258b   :  { %v2874_v55 = vpop.f32.mrb[28].mxu0 }
0x258c   :  { %v3824_v42 = vadd.f32 %v4863_v60, %v2874_v55  ;;  %v3616_v27 = vpop.f32.mrb[29].mxu0 }
0x258e   :  { %4029 = vtanh.f32 %v3824_v42  ;;  %v3231_v33 = vmul.f32 -1.442695, %v3824_v42 }
0x2590   :  { %4031 = vpow2.f32 %v3231_v33 }
0x2598   :  { %v4030_v12 = vpop.eup %4029 }
0x2599   :  { %2888 = vrot.lane.b32.xlu0 %v4030_v12, %s4219_s2 }
0x259a   :  { %v4032_v34 = vpop.eup %4031 }
0x259b   :  { %v2882_v57 = vadd.f32 1.0, %v4032_v34 }
0x259d   :  { %4033 = vrcp.f32 %v2882_v57 }
0x25a7   :  { %v4034_v3 = vpop.eup %4033 }
0x25a8   :  { %v2886_v17 = vmul.f32 %v4034_v3, %v2796_v19 }
0x260b   :  { %v2889_v58 = vpop.permute.xlu0 %2888 }
0x260c   :  { %v2891_v2 = vmul.f32 %v4034_v3, %v2889_v58 }
0x260e   :  { %2893 = vrot.lane.b32.xlu1 %v2891_v2, %s4219_s2  ;;  %v3237_v2 = vld [vmem:[#allocation2] ss:$0 sm:$0xff] }
0x2680   :  { %v2894_v44 = vpop.permute.xlu1 %2893 }
0x2681   :  { %v2896_v43 = vadd.f32 %v2894_v44, %v2886_v17 }
0x2683   :  { %4035 = vtanh.f32 %v2896_v43 }
0x268d   :  { %v4036_v60 = vpop.eup %4035 }
0x268e   :  { %2899 = vrot.lane.b32.xlu0 %v4036_v60, %s4219_s2 }
0x2700   :  { %v2900_v53 = vpop.permute.xlu0 %2899 }
0x2701   :  { %v2902_v51 = vmul.f32 %v4034_v3, %v2900_v53 }
0x2703   :  { %2904 = vrot.lane.b32.xlu1 %v2902_v51, %s4220_s17 }
0x2775   :  { %v2905_v1 = vpop.permute.xlu1 %2904 }
0x2776   :  { %3626 = vmatmul.mubr.msk.f32.vlgmr.msra.gmra.mrb[30].mxu0 %vm352_vm10, %v2905_v1 }
0x2849   :  { %v2974_v36 = vpop.f32.mrb[30].mxu0 }
0x284a   :  { %v3826_v37 = vadd.f32 %v4865_v63, %v2974_v36  ;;  %v3627_v54 = vpop.f32.mrb[31].mxu0 }
0x284c   :  { %4037 = vtanh.f32 %v3826_v37  ;;  %v3233_v59 = vmul.f32 -1.442695, %v3826_v37 }
0x284e   :  { %4039 = vpow2.f32 %v3233_v59 }
0x2856   :  { %v4038_v39 = vpop.eup %4037 }
0x2857   :  { %2988 = vrot.lane.b32.xlu0 %v4038_v39, %s4219_s2 }
0x2858   :  { %v4040_v49 = vpop.eup %4039 }
0x2859   :  { %v2982_v29 = vadd.f32 1.0, %v4040_v49 }
0x285b   :  { %4041 = vrcp.f32 %v2982_v29 }
0x2865   :  { %v4042_v61 = vpop.eup %4041 }
0x2866   :  { %v2986_v46 = vmul.f32 %v4042_v61, %v2896_v43 }
0x28c9   :  { %v2989_v0 = vpop.permute.xlu0 %2988 }
0x28ca   :  { %v2991_v48 = vmul.f32 %v4042_v61, %v2989_v0 }
0x28cc   :  { %2993 = vrot.lane.b32.xlu1 %v2991_v48, %s4219_s2 }
0x293e   :  { %v2994_v4 = vpop.permute.xlu1 %2993 }
0x293f   :  { %v2996_v5 = vadd.f32 %v2994_v4, %v2986_v46 }
0x2941   :  { %4043 = vtanh.f32 %v2996_v5 }
0x2942   :  { %4045 = vtanh.f32 %v4871_v47 }
0x2943   :  { %4047 = vpow2.f32 %v3221_v7 }
0x294b   :  { %v4044_v63 = vpop.eup %4043 }
0x294c   :  { %2999 = vrot.lane.b32.xlu0 %v4044_v63, %s4219_s2  ;;  %v4046_v45 = vpop.eup %4045 }
0x294d   :  { %v4048_v8 = vpop.eup %4047 }
0x294e   :  { %v2382_v9 = vadd.f32 1.0, %v4048_v8 }
0x2950   :  { %2388 = vrot.lane.b32.xlu0 %v4046_v45, %s4219_s2  ;;  %4049 = vrcp.f32 %v2382_v9 }
0x295a   :  { %v4050_v13 = vpop.eup %4049 }
0x295b   :  { %v2386_v23 = vmul.f32 0.0, %v4050_v13 }
0x29be   :  { %v3000_v10 = vpop.permute.xlu0 %2999 }
0x29bf   :  { %v3002_v11 = vmul.f32 %v4042_v61, %v3000_v10 }
0x29c1   :  { %3004 = vrot.lane.b32.xlu1 %v3002_v11, %s4220_s17 }
0x29c2   :  { %v2389_v52 = vpop.permute.xlu0 %2388 }
0x29c3   :  { %v2391_v14 = vmul.f32 %v4050_v13, %v2389_v52 }
0x29c5   :  { %2393 = vrot.lane.b32.xlu0 %v2391_v14, %s4219_s2 }
0x2a33   :  { %v3005_v16 = vpop.permute.xlu1 %3004 }
0x2a34   :  { %3637 = vmatmul.mubr.msk.f32.vlgmr.msra.gmra.mrb[48].mxu1 %vm352_vm10, %v3005_v16 }
0x2a37   :  { %v2394_v50 = vpop.permute.xlu0 %2393 }
0x2a38   :  { %v2396_v62 = vadd.f32 %v2394_v50, %v2386_v23 }
0x2a3a   :  { %4051 = vtanh.f32 %v2396_v62 }
0x2a44   :  { %v4052_v47 = vpop.eup %4051 }
0x2a45   :  { %2399 = vrot.lane.b32.xlu0 %v4052_v47, %s4219_s2 }
0x2a49   :  { %3109 = vrot.lane.b32.xlu0 %v3236_v32, %s4220_s17 }
0x2ab7   :  { %v2400_v56 = vpop.permute.xlu0 %2399 }
0x2ab8   :  { %v2402_v55 = vmul.f32 %v4050_v13, %v2400_v56 }
0x2abb   :  { %v3110_v31 = vpop.permute.xlu0 %3109 }
0x2b07   :  { %v3074_v18 = vpop.f32.mrb[48].mxu1 }
0x2b08   :  { %v3078_v24 = vadd.f32 %v3074_v18, %v4869_v6  ;;  %v3638_v21 = vpop.f32.mrb[49].mxu1 }
0x2b0a   :  { %4053 = vtanh.f32 %v3078_v24  ;;  %v3235_v30 = vmul.f32 -1.442695, %v3078_v24 }
0x2b0c   :  { %4055 = vpow2.f32 %v3235_v30 }
0x2b14   :  { %v4054_v25 = vpop.eup %4053 }
0x2b15   :  { %3088 = vrot.lane.b32.xlu1 %v4054_v25, %s4219_s2 }
0x2b16   :  { %v4056_v41 = vpop.eup %4055 }
0x2b17   :  { %v3082_v38 = vadd.f32 1.0, %v4056_v41 }
0x2b19   :  { %4057 = vrcp.f32 %v3082_v38 }
0x2b23   :  { %v4058_v35 = vpop.eup %4057 }
0x2b24   :  { %v3086_v6 = vmul.f32 %v4058_v35, %v2996_v5 }
0x2b87   :  { %v3089_v22 = vpop.permute.xlu1 %3088 }
0x2b88   :  { %v3091_v15 = vmul.f32 %v4058_v35, %v3089_v22 }
0x2b8a   :  { %3093 = vrot.lane.b32.xlu1 %v3091_v15, %s4219_s2 }
0x2bfc   :  { %v3094_v26 = vpop.permute.xlu1 %3093 }
0x2bfd   :  { %v3096_v40 = vadd.f32 %v3094_v26, %v3086_v6 }
0x2bff   :  { %4059 = vtanh.f32 %v3096_v40 }
0x2c09   :  { %v4060_v19 = vpop.eup %4059 }
0x2c0a   :  { %3099 = vrot.lane.b32.xlu1 %v4060_v19, %s4219_s2 }
0x2c0e   :  { %3120 = vrot.lane.b32.xlu1 %v3236_v32, %s4219_s2 }
0x2c7c   :  { %v3100_v28 = vpop.permute.xlu1 %3099 }
0x2c7d   :  { %v3102_v20 = vmul.f32 %v4058_v35, %v3100_v28 }
0x2c7f   :  { %v3112_v42 = vmul.f32 %v3110_v31, %v3102_v20 }
0x2c80   :  { %v3121_v27 = vpop.permute.xlu1 %3120 }
0x2c81   :  { %v3123_v12 = vmul.f32 %v3121_v27, %v2402_v55  ;;  %3114 = vrot.lane.b32.xlu0 %v3112_v42, %s4220_s17 }
0x2c83   :  { %3125 = vrot.lane.b32.xlu1 %v3123_v12, %s4220_s17 }
0x2cf3   :  { %v3115_v33 = vpop.permute.xlu0 %3114 }
0x2cf4   :  { %v3117_v34 = vsel %vm352_vm10, %v3115_v33, 0.0 }
0x2cf5   :  { %v3126_v57 = vpop.permute.xlu1 %3125  ;;  %3118 = vadd.xlane.f32.xlu0 %v3117_v34 }
0x2cf6   :  { %v3128_v3 = vsel %vm352_vm10, %v3126_v57, 0.0 }
0x2cf7   :  { %3129 = vadd.xlane.f32.xlu1 %v3128_v3 }
0x2d82   :  { %v3119_v58 = vpop.xlane.xlu0 %3118 }
0x2d84   :  { %v3130_v17 = vpop.xlane.xlu1 %3129 }
0x2d85   :  { %v3131_v44 = vadd.f32 %v3130_v17, %v3119_v58 }
0x2d87   :  { %v3139_v43 = vadd.f32 %v3237_v2, %v3131_v44 }
0x2d89   :  { %v3238_v60 = vmul.f32 -1.442695, %v3139_v43 }
0x2d8b   :  { %4061 = vpow2.f32 %v3238_v60 }
0x2d95   :  { %v4062_v53 = vpop.eup %4061 }
0x2d96   :  { %v3143_v51 = vadd.f32 1.0, %v4062_v53 }
0x2d98   :  { %4063 = vrcp.f32 %v3143_v51 }
0x2da2   :  { %v4064_v1 = vpop.eup %4063 }
0x2da3   :  { %3147 = vst.msk [vmem:[%s4974_s12] sm:$0xff] %vm3146_vm12, %v4064_v1 }
0x2da4   :  { %3152 = vsyncpa [#allocation4], 1 }
0x2da5   :  { %3153 = vsyncpa [#allocation6], 1 }
0x2da6   :  { %3154 = vsyncpa [#allocation9], 1 }
0x2da7   :  { %3155 = vsyncpa [#allocation12], 1 }

</bundles_post_ra>
